<compile_context>
chip_gen: v7x
topology: tpu7x:2x2x1
jax: 0.10.0
libtpu: 0.0.40
codegen_flags: <defaults>
</compile_context>

<pallas_src>
import jax
import jax.numpy as jnp
from jax.experimental import pallas as pl
from jax.experimental.pallas import tpu as pltpu


# ----------------------------- Pallas kernels -------------------------------

def _lstm_cell(gates, c_prev, H):
    """PyTorch gate order i, f, g, o."""
    i_g = jax.nn.sigmoid(gates[:, 0:H])
    f_g = jax.nn.sigmoid(gates[:, H:2 * H])
    g_g = jnp.tanh(gates[:, 2 * H:3 * H])
    o_g = jax.nn.sigmoid(gates[:, 3 * H:4 * H])
    c_new = f_g * c_prev + i_g * g_g
    h_new = o_g * jnp.tanh(c_new)
    return h_new, c_new


def _bilstm_recurrence(x_ref, len_ref, wih_ref, whhf_ref, whhb_ref, bf_ref, bb_ref,
                       seq_ref=None):
    """Fused fwd+bwd LSTM over a fully VMEM-resident sequence.

    x_ref:    (T*B, I)  time-major, flattened (t, b) rows
    len_ref:  (B, 1)    float lengths
    wih_ref:  (I, 8H)   [w_ih_fwd | w_ih_bwd] concatenated along the gate axis
    whh*_ref: (H, 4H),  b*_ref: (1, 4H)  (b_ih + b_hh pre-summed)
    seq_ref:  optional (T*B, 2H) output ref -> [fwd | bwd] hidden per timestep.
    Returns (h_fwd_final, h_bwd_final), each (B, H) fp32.
    """
    B = len_ref.shape[0]
    T = x_ref.shape[0] // B
    H = whhf_ref.shape[0]
    G = 4 * H

    lens = len_ref[...]                                   # (B, 1) f32
    whh_f = whhf_ref[...]
    whh_b = whhb_ref[...]
    b_f = bf_ref[...]
    b_b = bb_ref[...]

    # One MXU pass: input projection for all timesteps of both directions.
    xg = jnp.dot(x_ref[...], wih_ref[...],
                 preferred_element_type=jnp.float32)      # (T*B, 8H)

    h_f = jnp.zeros((B, H), jnp.float32)
    c_f = jnp.zeros((B, H), jnp.float32)
    h_b = jnp.zeros((B, H), jnp.float32)
    c_b = jnp.zeros((B, H), jnp.float32)

    for s in range(T):                                    # static, fully unrolled
        tb = T - 1 - s
        m_f = lens > s                                    # (B, 1) bool: step valid (fwd)
        m_b = lens > tb                                   # (B, 1) bool: step valid (bwd)

        g_f = (xg[s * B:(s + 1) * B, 0:G]
               + jnp.dot(h_f, whh_f, preferred_element_type=jnp.float32) + b_f)
        g_b = (xg[tb * B:(tb + 1) * B, G:2 * G]
               + jnp.dot(h_b, whh_b, preferred_element_type=jnp.float32) + b_b)

        hfn, cfn = _lstm_cell(g_f, c_f, H)
        hbn, cbn = _lstm_cell(g_b, c_b, H)

        # packed-sequence semantics: state freezes past the sequence end
        h_f = jnp.where(m_f, hfn, h_f)
        c_f = jnp.where(m_f, cfn, c_f)
        h_b = jnp.where(m_b, hbn, h_b)
        c_b = jnp.where(m_b, cbn, c_b)

        if seq_ref is not None:                           # padded positions -> 0
            seq_ref[s * B:(s + 1) * B, 0:H] = jnp.where(m_f, hfn, 0.0).astype(seq_ref.dtype)
            seq_ref[tb * B:(tb + 1) * B, H:2 * H] = jnp.where(m_b, hbn, 0.0).astype(seq_ref.dtype)

    return h_f, h_b


def bilstm_seq_kernel(x_ref, len_ref, wih_ref, whhf_ref, whhb_ref, bf_ref, bb_ref, seq_ref):
    """Intermediate bidirectional layer: emits the concatenated output sequence."""
    _bilstm_recurrence(x_ref, len_ref, wih_ref, whhf_ref, whhb_ref, bf_ref, bb_ref,
                       seq_ref=seq_ref)


def bilstm_fc_kernel(x_ref, len_ref, wih_ref, whhf_ref, whhb_ref, bf_ref, bb_ref,
                     fcw_ref, fcb_ref, out_ref):
    """Last bidirectional layer fused with the final Linear + Sigmoid head."""
    h_f, h_b = _bilstm_recurrence(x_ref, len_ref, wih_ref, whhf_ref, whhb_ref, bf_ref, bb_ref)
    H = whhf_ref.shape[0]
    # cat(h_fwd, h_bwd) @ fc_w  ==  h_fwd @ fc_w[:H] + h_bwd @ fc_w[H:]
    z = (jnp.dot(h_f, fcw_ref[0:H, :], preferred_element_type=jnp.float32)
         + jnp.dot(h_b, fcw_ref[H:2 * H, :], preferred_element_type=jnp.float32)
         + fcb_ref[...])
    out_ref[...] = jax.nn.sigmoid(z).astype(out_ref.dtype)


# ----------------------------- wrappers --------------------------------------

def _vmem_specs(n):
    return [pl.BlockSpec(memory_space=pltpu.MemorySpace.VMEM)] * n


def bilstm_layer(x2, lens_f, wih_cat, whh_f, whh_b, b_f, b_b):
    TB = x2.shape[0]
    H = whh_f.shape[0]
    return pl.pallas_call(
        bilstm_seq_kernel,
        out_shape=jax.ShapeDtypeStruct((TB, 2 * H), jnp.float32),
        in_specs=_vmem_specs(7),
        out_specs=pl.BlockSpec(memory_space=pltpu.MemorySpace.VMEM),
    )(x2, lens_f, wih_cat, whh_f, whh_b, b_f, b_b)


def bilstm_final_fc(x2, lens_f, wih_cat, whh_f, whh_b, b_f, b_b, fc_w, fc_b):
    B = lens_f.shape[0]
    O = fc_w.shape[1]
    return pl.pallas_call(
        bilstm_fc_kernel,
        out_shape=jax.ShapeDtypeStruct((B, O), jnp.float32),
        in_specs=_vmem_specs(9),
        out_specs=pl.BlockSpec(memory_space=pltpu.MemorySpace.VMEM),
    )(x2, lens_f, wih_cat, whh_f, whh_b, b_f, b_b, fc_w, fc_b)


def text_classifier_forward(text, text_lengths, params):
    """text: (T, B) int32 (sequence-major), text_lengths: (B,) int32."""
    # TODO(synk): embedding gather kept in XLA glue; an in-kernel DMA gather of table rows
    # is only worthwhile at production E/T/B sizes.
    emb = params["embedding"][text]                       # (T, B, E)
    T, B, E = emb.shape
    x2 = emb.reshape(T * B, E)                            # time-major, flattened (t, b)
    lens_f = text_lengths.astype(jnp.float32).reshape(B, 1)

    n_layers = len(params["lstm"])
    out = None
    for li, ((w_if, w_hf, b_f), (w_ib, w_hb, b_b)) in enumerate(params["lstm"]):
        wih_cat = jnp.concatenate([w_if, w_ib], axis=1)   # (I, 8H): fwd|bwd gate columns
        if li < n_layers - 1:
            x2 = bilstm_layer(x2, lens_f, wih_cat, w_hf, w_hb, b_f, b_b)
        else:
            out = bilstm_final_fc(x2, lens_f, wih_cat, w_hf, w_hb, b_f, b_b,
                                  params["fc_w"], params["fc_b"])
    # TODO(synk): inter-layer dropout omitted (module is run with dropout=0.0)
    return out


# ----------------------------- pure-JAX reference ----------------------------

def _ref_lstm_dir(x, mask, w_ih, w_hh, b, reverse):
    T, B, _ = x.shape
    H = w_hh.shape[0]
    h = jnp.zeros((B, H), jnp.float32)
    c = jnp.zeros((B, H), jnp.float32)
    out = [None] * T
    ts = range(T - 1, -1, -1) if reverse else range(T)
    for t in ts:
        m = mask[t]
        gates = x[t] @ w_ih + h @ w_hh + b
        i_g = jax.nn.sigmoid(gates[:, 0:H])
        f_g = jax.nn.sigmoid(gates[:, H:2 * H])
        g_g = jnp.tanh(gates[:, 2 * H:3 * H])
        o_g = jax.nn.sigmoid(gates[:, 3 * H:4 * H])
        c_new = f_g * c + i_g * g_g
        h_new = o_g * jnp.tanh(c_new)
        c = m * c_new + (1.0 - m) * c
        h = m * h_new + (1.0 - m) * h
        out[t] = m * h_new
    return jnp.stack(out, 0), h


def _ref_forward(text, lengths, params):
    emb = params["embedding"][text]
    T = emb.shape[0]
    mask = (jnp.arange(T)[:, None] < lengths[None, :]).astype(jnp.float32)[:, :, None]
    x = emb
    hf = hb = None
    for (w_if, w_hf, b_f), (w_ib, w_hb, b_b) in params["lstm"]:
        sf, hf = _ref_lstm_dir(x, mask, w_if, w_hf, b_f, False)
        sb, hb = _ref_lstm_dir(x, mask, w_ib, w_hb, b_b, True)
        x = jnp.concatenate([sf, sb], -1)
    hidden = jnp.concatenate([hf, hb], 1)
    return jax.nn.sigmoid(hidden @ params["fc_w"] + params["fc_b"])


# ----------------------------- main -------------------------------------------

if __name__ == "__main__":
    # Hyperparameters of Textclassifier(vocab_size, embedding_dim, hidden_dim,
    #                                   output_dim, n_layers, bidirectional=True,
    #                                   dropout=0.0, pad_idx=0, freeze=False)
    VOCAB, EMB, HID, OUT = 50, 32, 32, 4
    N_LAYERS, PAD_IDX = 2, 0
    T, B = 8, 2

    key = jax.random.PRNGKey(0)
    keys = iter(jax.random.split(key, 64))

    emb_table = 0.1 * jax.random.normal(next(keys), (VOCAB, EMB), jnp.float32)
    emb_table = emb_table.at[PAD_IDX].set(0.0)          # padding_idx row is zero

    lstm_params = []
    for layer in range(N_LAYERS):
        in_dim = EMB if layer == 0 else 2 * HID
        dirs = []
        for _ in range(2):                              # forward, backward
            w_ih = 0.1 * jax.random.normal(next(keys), (in_dim, 4 * HID), jnp.float32)
            w_hh = 0.1 * jax.random.normal(next(keys), (HID, 4 * HID), jnp.float32)
            bias = 0.1 * jax.random.normal(next(keys), (1, 4 * HID), jnp.float32)  # b_ih+b_hh
            dirs.append((w_ih, w_hh, bias))
        lstm_params.append(tuple(dirs))

    fc_w = 0.1 * jax.random.normal(next(keys), (2 * HID, OUT), jnp.float32)
    fc_b = 0.1 * jax.random.normal(next(keys), (1, OUT), jnp.float32)

    params = {"embedding": emb_table, "lstm": lstm_params, "fc_w": fc_w, "fc_b": fc_b}

    # Inputs: (T, B) tokens, descending lengths (pack_padded_sequence enforce_sorted).
    text = jax.random.randint(next(keys), (T, B), 1, VOCAB, dtype=jnp.int32)
    text_lengths = jnp.array([T, T - 3], dtype=jnp.int32)

    out = jax.block_until_ready(text_classifier_forward(text, text_lengths, params))
    ref = jax.block_until_ready(_ref_forward(text, text_lengths, params))

    assert out.shape == (B, OUT)
    assert jnp.allclose(out, ref, atol=1e-5, rtol=1e-5), (out, ref)
    print("KERNEL_OK")
</pallas_src>

<mosaic_0001>
module attributes {stable_mosaic.version = 11 : i64} {
  func.func @bilstm_seq_kernel(%arg0: memref<16x32xf32, #tpu.memory_space<vmem>>, %arg1: memref<2x1xf32, #tpu.memory_space<vmem>>, %arg2: memref<32x256xf32, #tpu.memory_space<vmem>>, %arg3: memref<32x128xf32, #tpu.memory_space<vmem>>, %arg4: memref<32x128xf32, #tpu.memory_space<vmem>>, %arg5: memref<1x128xf32, #tpu.memory_space<vmem>>, %arg6: memref<1x128xf32, #tpu.memory_space<vmem>>, %arg7: memref<16x64xf32, #tpu.memory_space<vmem>>) attributes {dimension_semantics = [], scalar_prefetch = 0 : i64, scratch_operands = 0 : i64, tpu.core_type = #tpu.core_type<tc>} {
    %c0 = arith.constant 0 : index
    %c0_0 = arith.constant 0 : index
    %0 = vector.load %arg1[%c0, %c0_0] : memref<2x1xf32, #tpu.memory_space<vmem>>, vector<2x1xf32>
    %c0_1 = arith.constant 0 : index
    %c0_2 = arith.constant 0 : index
    %1 = vector.load %arg3[%c0_1, %c0_2] : memref<32x128xf32, #tpu.memory_space<vmem>>, vector<32x128xf32>
    %c0_3 = arith.constant 0 : index
    %c0_4 = arith.constant 0 : index
    %2 = vector.load %arg4[%c0_3, %c0_4] : memref<32x128xf32, #tpu.memory_space<vmem>>, vector<32x128xf32>
    %c0_5 = arith.constant 0 : index
    %c0_6 = arith.constant 0 : index
    %3 = vector.load %arg5[%c0_5, %c0_6] : memref<1x128xf32, #tpu.memory_space<vmem>>, vector<1x128xf32>
    %c0_7 = arith.constant 0 : index
    %c0_8 = arith.constant 0 : index
    %4 = vector.load %arg6[%c0_7, %c0_8] : memref<1x128xf32, #tpu.memory_space<vmem>>, vector<1x128xf32>
    %c0_9 = arith.constant 0 : index
    %c0_10 = arith.constant 0 : index
    %5 = vector.load %arg0[%c0_9, %c0_10] : memref<16x32xf32, #tpu.memory_space<vmem>>, vector<16x32xf32>
    %c0_11 = arith.constant 0 : index
    %c0_12 = arith.constant 0 : index
    %6 = vector.load %arg2[%c0_11, %c0_12] : memref<32x256xf32, #tpu.memory_space<vmem>>, vector<32x256xf32>
    %cst = arith.constant dense<0.000000e+00> : vector<16x256xf32>
    %7 = tpu.matmul %5, %6, %cst {dimension_numbers = #tpu.dot_dimension_numbers<[1], [0], [0], [1], [0, 0, 1, 1], [], []>} : vector<16x32xf32>, vector<32x256xf32>, vector<16x256xf32> -> vector<16x256xf32>
    %cst_13 = arith.constant 0.000000e+00 : f32
    %8 = vector.broadcast %cst_13 : f32 to vector<2x32xf32>
    %cst_14 = arith.constant 0.000000e+00 : f32
    %9 = vector.broadcast %cst_14 : f32 to vector<2x32xf32>
    %cst_15 = arith.constant 0.000000e+00 : f32
    %10 = vector.broadcast %cst_15 : f32 to vector<2x32xf32>
    %cst_16 = arith.constant 0.000000e+00 : f32
    %11 = vector.broadcast %cst_16 : f32 to vector<2x32xf32>
    %cst_17 = arith.constant 0.000000e+00 : f32
    %12 = vector.broadcast %cst_17 : f32 to vector<2x1xf32>
    %13 = arith.cmpf ogt, %0, %12 : vector<2x1xf32>
    %cst_18 = arith.constant 7.000000e+00 : f32
    %14 = vector.broadcast %cst_18 : f32 to vector<2x1xf32>
    %15 = arith.cmpf ogt, %0, %14 : vector<2x1xf32>
    %16 = vector.extract_strided_slice %7 {offsets = [0, 0], sizes = [2, 128], strides = [1, 1]} : vector<16x256xf32> to vector<2x128xf32>
    %cst_19 = arith.constant dense<0.000000e+00> : vector<2x128xf32>
    %17 = tpu.matmul %8, %1, %cst_19 {dimension_numbers = #tpu.dot_dimension_numbers<[1], [0], [0], [1], [0, 0, 1, 1], [], []>} : vector<2x32xf32>, vector<32x128xf32>, vector<2x128xf32> -> vector<2x128xf32>
    %18 = arith.addf %16, %17 : vector<2x128xf32>
    %19 = vector.broadcast %3 : vector<1x128xf32> to vector<2x128xf32>
    %20 = arith.addf %18, %19 : vector<2x128xf32>
    %21 = vector.extract_strided_slice %7 {offsets = [14, 128], sizes = [2, 128], strides = [1, 1]} : vector<16x256xf32> to vector<2x128xf32>
    %cst_20 = arith.constant dense<0.000000e+00> : vector<2x128xf32>
    %22 = tpu.matmul %10, %2, %cst_20 {dimension_numbers = #tpu.dot_dimension_numbers<[1], [0], [0], [1], [0, 0, 1, 1], [], []>} : vector<2x32xf32>, vector<32x128xf32>, vector<2x128xf32> -> vector<2x128xf32>
    %23 = arith.addf %21, %22 : vector<2x128xf32>
    %24 = vector.broadcast %4 : vector<1x128xf32> to vector<2x128xf32>
    %25 = arith.addf %23, %24 : vector<2x128xf32>
    %26 = vector.extract_strided_slice %20 {offsets = [0, 0], sizes = [2, 32], strides = [1, 1]} : vector<2x128xf32> to vector<2x32xf32>
    %27 = arith.negf %26 : vector<2x32xf32>
    %28 = math.exp %27 : vector<2x32xf32>
    %cst_21 = arith.constant 1.000000e+00 : f32
    %29 = vector.broadcast %cst_21 : f32 to vector<2x32xf32>
    %30 = arith.addf %29, %28 : vector<2x32xf32>
    %31 = arith.divf %29, %30 : vector<2x32xf32>
    %32 = vector.extract_strided_slice %20 {offsets = [0, 32], sizes = [2, 32], strides = [1, 1]} : vector<2x128xf32> to vector<2x32xf32>
    %33 = arith.negf %32 : vector<2x32xf32>
    %34 = math.exp %33 : vector<2x32xf32>
    %cst_22 = arith.constant 1.000000e+00 : f32
    %35 = vector.broadcast %cst_22 : f32 to vector<2x32xf32>
    %36 = arith.addf %35, %34 : vector<2x32xf32>
    %37 = arith.divf %35, %36 : vector<2x32xf32>
    %38 = vector.extract_strided_slice %20 {offsets = [0, 64], sizes = [2, 32], strides = [1, 1]} : vector<2x128xf32> to vector<2x32xf32>
    %39 = math.tanh %38 : vector<2x32xf32>
    %40 = vector.extract_strided_slice %20 {offsets = [0, 96], sizes = [2, 32], strides = [1, 1]} : vector<2x128xf32> to vector<2x32xf32>
    %41 = arith.negf %40 : vector<2x32xf32>
    %42 = math.exp %41 : vector<2x32xf32>
    %cst_23 = arith.constant 1.000000e+00 : f32
    %43 = vector.broadcast %cst_23 : f32 to vector<2x32xf32>
    %44 = arith.addf %43, %42 : vector<2x32xf32>
    %45 = arith.divf %43, %44 : vector<2x32xf32>
    %46 = arith.mulf %37, %9 : vector<2x32xf32>
    %47 = arith.mulf %31, %39 : vector<2x32xf32>
    %48 = arith.addf %46, %47 : vector<2x32xf32>
    %49 = math.tanh %48 : vector<2x32xf32>
    %50 = arith.mulf %45, %49 : vector<2x32xf32>
    %51 = vector.extract_strided_slice %25 {offsets = [0, 0], sizes = [2, 32], strides = [1, 1]} : vector<2x128xf32> to vector<2x32xf32>
    %52 = arith.negf %51 : vector<2x32xf32>
    %53 = math.exp %52 : vector<2x32xf32>
    %cst_24 = arith.constant 1.000000e+00 : f32
    %54 = vector.broadcast %cst_24 : f32 to vector<2x32xf32>
    %55 = arith.addf %54, %53 : vector<2x32xf32>
    %56 = arith.divf %54, %55 : vector<2x32xf32>
    %57 = vector.extract_strided_slice %25 {offsets = [0, 32], sizes = [2, 32], strides = [1, 1]} : vector<2x128xf32> to vector<2x32xf32>
    %58 = arith.negf %57 : vector<2x32xf32>
    %59 = math.exp %58 : vector<2x32xf32>
    %cst_25 = arith.constant 1.000000e+00 : f32
    %60 = vector.broadcast %cst_25 : f32 to vector<2x32xf32>
    %61 = arith.addf %60, %59 : vector<2x32xf32>
    %62 = arith.divf %60, %61 : vector<2x32xf32>
    %63 = vector.extract_strided_slice %25 {offsets = [0, 64], sizes = [2, 32], strides = [1, 1]} : vector<2x128xf32> to vector<2x32xf32>
    %64 = math.tanh %63 : vector<2x32xf32>
    %65 = vector.extract_strided_slice %25 {offsets = [0, 96], sizes = [2, 32], strides = [1, 1]} : vector<2x128xf32> to vector<2x32xf32>
    %66 = arith.negf %65 : vector<2x32xf32>
    %67 = math.exp %66 : vector<2x32xf32>
    %cst_26 = arith.constant 1.000000e+00 : f32
    %68 = vector.broadcast %cst_26 : f32 to vector<2x32xf32>
    %69 = arith.addf %68, %67 : vector<2x32xf32>
    %70 = arith.divf %68, %69 : vector<2x32xf32>
    %71 = arith.mulf %62, %11 : vector<2x32xf32>
    %72 = arith.mulf %56, %64 : vector<2x32xf32>
    %73 = arith.addf %71, %72 : vector<2x32xf32>
    %74 = math.tanh %73 : vector<2x32xf32>
    %75 = arith.mulf %70, %74 : vector<2x32xf32>
    %76 = vector.shape_cast %13 : vector<2x1xi1> to vector<2x1xi1>
    %77 = vector.broadcast %76 : vector<2x1xi1> to vector<2x32xi1>
    %78 = arith.select %77, %50, %8 : vector<2x32xi1>, vector<2x32xf32>
    %79 = vector.shape_cast %13 : vector<2x1xi1> to vector<2x1xi1>
    %80 = vector.broadcast %79 : vector<2x1xi1> to vector<2x32xi1>
    %81 = arith.select %80, %48, %9 : vector<2x32xi1>, vector<2x32xf32>
    %82 = vector.shape_cast %15 : vector<2x1xi1> to vector<2x1xi1>
    %83 = vector.broadcast %82 : vector<2x1xi1> to vector<2x32xi1>
    %84 = arith.select %83, %75, %10 : vector<2x32xi1>, vector<2x32xf32>
    %85 = vector.shape_cast %15 : vector<2x1xi1> to vector<2x1xi1>
    %86 = vector.broadcast %85 : vector<2x1xi1> to vector<2x32xi1>
    %87 = arith.select %86, %73, %11 : vector<2x32xi1>, vector<2x32xf32>
    %cst_27 = arith.constant 0.000000e+00 : f32
    %88 = vector.shape_cast %13 : vector<2x1xi1> to vector<2x1xi1>
    %89 = vector.broadcast %88 : vector<2x1xi1> to vector<2x32xi1>
    %90 = vector.broadcast %cst_27 : f32 to vector<2x32xf32>
    %91 = arith.select %89, %50, %90 : vector<2x32xi1>, vector<2x32xf32>
    %c0_28 = arith.constant 0 : index
    %c0_29 = arith.constant 0 : index
    %92 = vector.load %arg7[%c0_28, %c0_29] : memref<16x64xf32, #tpu.memory_space<vmem>>, vector<2x32xf32>
    tpu.vector_store %arg7[%c0_28, %c0_29], %91 {strides = array<i32>} : memref<16x64xf32, #tpu.memory_space<vmem>>, vector<2x32xf32>,
    %cst_30 = arith.constant 0.000000e+00 : f32
    %93 = vector.shape_cast %15 : vector<2x1xi1> to vector<2x1xi1>
    %94 = vector.broadcast %93 : vector<2x1xi1> to vector<2x32xi1>
    %95 = vector.broadcast %cst_30 : f32 to vector<2x32xf32>
    %96 = arith.select %94, %75, %95 : vector<2x32xi1>, vector<2x32xf32>
    %c14 = arith.constant 14 : index
    %c32 = arith.constant 32 : index
    %97 = vector.load %arg7[%c14, %c32] : memref<16x64xf32, #tpu.memory_space<vmem>>, vector<2x32xf32>
    tpu.vector_store %arg7[%c14, %c32], %96 {strides = array<i32>} : memref<16x64xf32, #tpu.memory_space<vmem>>, vector<2x32xf32>,
    %cst_31 = arith.constant 1.000000e+00 : f32
    %98 = vector.broadcast %cst_31 : f32 to vector<2x1xf32>
    %99 = arith.cmpf ogt, %0, %98 : vector<2x1xf32>
    %cst_32 = arith.constant 6.000000e+00 : f32
    %100 = vector.broadcast %cst_32 : f32 to vector<2x1xf32>
    %101 = arith.cmpf ogt, %0, %100 : vector<2x1xf32>
    %102 = vector.extract_strided_slice %7 {offsets = [2, 0], sizes = [2, 128], strides = [1, 1]} : vector<16x256xf32> to vector<2x128xf32>
    %cst_33 = arith.constant dense<0.000000e+00> : vector<2x128xf32>
    %103 = tpu.matmul %78, %1, %cst_33 {dimension_numbers = #tpu.dot_dimension_numbers<[1], [0], [0], [1], [0, 0, 1, 1], [], []>} : vector<2x32xf32>, vector<32x128xf32>, vector<2x128xf32> -> vector<2x128xf32>
    %104 = arith.addf %102, %103 : vector<2x128xf32>
    %105 = vector.broadcast %3 : vector<1x128xf32> to vector<2x128xf32>
    %106 = arith.addf %104, %105 : vector<2x128xf32>
    %107 = vector.extract_strided_slice %7 {offsets = [12, 128], sizes = [2, 128], strides = [1, 1]} : vector<16x256xf32> to vector<2x128xf32>
    %cst_34 = arith.constant dense<0.000000e+00> : vector<2x128xf32>
    %108 = tpu.matmul %84, %2, %cst_34 {dimension_numbers = #tpu.dot_dimension_numbers<[1], [0], [0], [1], [0, 0, 1, 1], [], []>} : vector<2x32xf32>, vector<32x128xf32>, vector<2x128xf32> -> vector<2x128xf32>
    %109 = arith.addf %107, %108 : vector<2x128xf32>
    %110 = vector.broadcast %4 : vector<1x128xf32> to vector<2x128xf32>
    %111 = arith.addf %109, %110 : vector<2x128xf32>
    %112 = vector.extract_strided_slice %106 {offsets = [0, 0], sizes = [2, 32], strides = [1, 1]} : vector<2x128xf32> to vector<2x32xf32>
    %113 = arith.negf %112 : vector<2x32xf32>
    %114 = math.exp %113 : vector<2x32xf32>
    %cst_35 = arith.constant 1.000000e+00 : f32
    %115 = vector.broadcast %cst_35 : f32 to vector<2x32xf32>
    %116 = arith.addf %115, %114 : vector<2x32xf32>
    %117 = arith.divf %115, %116 : vector<2x32xf32>
    %118 = vector.extract_strided_slice %106 {offsets = [0, 32], sizes = [2, 32], strides = [1, 1]} : vector<2x128xf32> to vector<2x32xf32>
    %119 = arith.negf %118 : vector<2x32xf32>
    %120 = math.exp %119 : vector<2x32xf32>
    %cst_36 = arith.constant 1.000000e+00 : f32
    %121 = vector.broadcast %cst_36 : f32 to vector<2x32xf32>
    %122 = arith.addf %121, %120 : vector<2x32xf32>
    %123 = arith.divf %121, %122 : vector<2x32xf32>
    %124 = vector.extract_strided_slice %106 {offsets = [0, 64], sizes = [2, 32], strides = [1, 1]} : vector<2x128xf32> to vector<2x32xf32>
    %125 = math.tanh %124 : vector<2x32xf32>
    %126 = vector.extract_strided_slice %106 {offsets = [0, 96], sizes = [2, 32], strides = [1, 1]} : vector<2x128xf32> to vector<2x32xf32>
    %127 = arith.negf %126 : vector<2x32xf32>
    %128 = math.exp %127 : vector<2x32xf32>
    %cst_37 = arith.constant 1.000000e+00 : f32
    %129 = vector.broadcast %cst_37 : f32 to vector<2x32xf32>
    %130 = arith.addf %129, %128 : vector<2x32xf32>
    %131 = arith.divf %129, %130 : vector<2x32xf32>
    %132 = arith.mulf %123, %81 : vector<2x32xf32>
    %133 = arith.mulf %117, %125 : vector<2x32xf32>
    %134 = arith.addf %132, %133 : vector<2x32xf32>
    %135 = math.tanh %134 : vector<2x32xf32>
    %136 = arith.mulf %131, %135 : vector<2x32xf32>
    %137 = vector.extract_strided_slice %111 {offsets = [0, 0], sizes = [2, 32], strides = [1, 1]} : vector<2x128xf32> to vector<2x32xf32>
    %138 = arith.negf %137 : vector<2x32xf32>
    %139 = math.exp %138 : vector<2x32xf32>
    %cst_38 = arith.constant 1.000000e+00 : f32
    %140 = vector.broadcast %cst_38 : f32 to vector<2x32xf32>
    %141 = arith.addf %140, %139 : vector<2x32xf32>
    %142 = arith.divf %140, %141 : vector<2x32xf32>
    %143 = vector.extract_strided_slice %111 {offsets = [0, 32], sizes = [2, 32], strides = [1, 1]} : vector<2x128xf32> to vector<2x32xf32>
    %144 = arith.negf %143 : vector<2x32xf32>
    %145 = math.exp %144 : vector<2x32xf32>
    %cst_39 = arith.constant 1.000000e+00 : f32
    %146 = vector.broadcast %cst_39 : f32 to vector<2x32xf32>
    %147 = arith.addf %146, %145 : vector<2x32xf32>
    %148 = arith.divf %146, %147 : vector<2x32xf32>
    %149 = vector.extract_strided_slice %111 {offsets = [0, 64], sizes = [2, 32], strides = [1, 1]} : vector<2x128xf32> to vector<2x32xf32>
    %150 = math.tanh %149 : vector<2x32xf32>
    %151 = vector.extract_strided_slice %111 {offsets = [0, 96], sizes = [2, 32], strides = [1, 1]} : vector<2x128xf32> to vector<2x32xf32>
    %152 = arith.negf %151 : vector<2x32xf32>
    %153 = math.exp %152 : vector<2x32xf32>
    %cst_40 = arith.constant 1.000000e+00 : f32
    %154 = vector.broadcast %cst_40 : f32 to vector<2x32xf32>
    %155 = arith.addf %154, %153 : vector<2x32xf32>
    %156 = arith.divf %154, %155 : vector<2x32xf32>
    %157 = arith.mulf %148, %87 : vector<2x32xf32>
    %158 = arith.mulf %142, %150 : vector<2x32xf32>
    %159 = arith.addf %157, %158 : vector<2x32xf32>
    %160 = math.tanh %159 : vector<2x32xf32>
    %161 = arith.mulf %156, %160 : vector<2x32xf32>
    %162 = vector.shape_cast %99 : vector<2x1xi1> to vector<2x1xi1>
    %163 = vector.broadcast %162 : vector<2x1xi1> to vector<2x32xi1>
    %164 = arith.select %163, %136, %78 : vector<2x32xi1>, vector<2x32xf32>
    %165 = vector.shape_cast %99 : vector<2x1xi1> to vector<2x1xi1>
    %166 = vector.broadcast %165 : vector<2x1xi1> to vector<2x32xi1>
    %167 = arith.select %166, %134, %81 : vector<2x32xi1>, vector<2x32xf32>
    %168 = vector.shape_cast %101 : vector<2x1xi1> to vector<2x1xi1>
    %169 = vector.broadcast %168 : vector<2x1xi1> to vector<2x32xi1>
    %170 = arith.select %169, %161, %84 : vector<2x32xi1>, vector<2x32xf32>
    %171 = vector.shape_cast %101 : vector<2x1xi1> to vector<2x1xi1>
    %172 = vector.broadcast %171 : vector<2x1xi1> to vector<2x32xi1>
    %173 = arith.select %172, %159, %87 : vector<2x32xi1>, vector<2x32xf32>
    %cst_41 = arith.constant 0.000000e+00 : f32
    %174 = vector.shape_cast %99 : vector<2x1xi1> to vector<2x1xi1>
    %175 = vector.broadcast %174 : vector<2x1xi1> to vector<2x32xi1>
    %176 = vector.broadcast %cst_41 : f32 to vector<2x32xf32>
    %177 = arith.select %175, %136, %176 : vector<2x32xi1>, vector<2x32xf32>
    %c2 = arith.constant 2 : index
    %c0_42 = arith.constant 0 : index
    %178 = vector.load %arg7[%c2, %c0_42] : memref<16x64xf32, #tpu.memory_space<vmem>>, vector<2x32xf32>
    tpu.vector_store %arg7[%c2, %c0_42], %177 {strides = array<i32>} : memref<16x64xf32, #tpu.memory_space<vmem>>, vector<2x32xf32>,
    %cst_43 = arith.constant 0.000000e+00 : f32
    %179 = vector.shape_cast %101 : vector<2x1xi1> to vector<2x1xi1>
    %180 = vector.broadcast %179 : vector<2x1xi1> to vector<2x32xi1>
    %181 = vector.broadcast %cst_43 : f32 to vector<2x32xf32>
    %182 = arith.select %180, %161, %181 : vector<2x32xi1>, vector<2x32xf32>
    %c12 = arith.constant 12 : index
    %c32_44 = arith.constant 32 : index
    %183 = vector.load %arg7[%c12, %c32_44] : memref<16x64xf32, #tpu.memory_space<vmem>>, vector<2x32xf32>
    tpu.vector_store %arg7[%c12, %c32_44], %182 {strides = array<i32>} : memref<16x64xf32, #tpu.memory_space<vmem>>, vector<2x32xf32>,
    %cst_45 = arith.constant 2.000000e+00 : f32
    %184 = vector.broadcast %cst_45 : f32 to vector<2x1xf32>
    %185 = arith.cmpf ogt, %0, %184 : vector<2x1xf32>
    %cst_46 = arith.constant 5.000000e+00 : f32
    %186 = vector.broadcast %cst_46 : f32 to vector<2x1xf32>
    %187 = arith.cmpf ogt, %0, %186 : vector<2x1xf32>
    %188 = vector.extract_strided_slice %7 {offsets = [4, 0], sizes = [2, 128], strides = [1, 1]} : vector<16x256xf32> to vector<2x128xf32>
    %cst_47 = arith.constant dense<0.000000e+00> : vector<2x128xf32>
    %189 = tpu.matmul %164, %1, %cst_47 {dimension_numbers = #tpu.dot_dimension_numbers<[1], [0], [0], [1], [0, 0, 1, 1], [], []>} : vector<2x32xf32>, vector<32x128xf32>, vector<2x128xf32> -> vector<2x128xf32>
    %190 = arith.addf %188, %189 : vector<2x128xf32>
    %191 = vector.broadcast %3 : vector<1x128xf32> to vector<2x128xf32>
    %192 = arith.addf %190, %191 : vector<2x128xf32>
    %193 = vector.extract_strided_slice %7 {offsets = [10, 128], sizes = [2, 128], strides = [1, 1]} : vector<16x256xf32> to vector<2x128xf32>
    %cst_48 = arith.constant dense<0.000000e+00> : vector<2x128xf32>
    %194 = tpu.matmul %170, %2, %cst_48 {dimension_numbers = #tpu.dot_dimension_numbers<[1], [0], [0], [1], [0, 0, 1, 1], [], []>} : vector<2x32xf32>, vector<32x128xf32>, vector<2x128xf32> -> vector<2x128xf32>
    %195 = arith.addf %193, %194 : vector<2x128xf32>
    %196 = vector.broadcast %4 : vector<1x128xf32> to vector<2x128xf32>
    %197 = arith.addf %195, %196 : vector<2x128xf32>
    %198 = vector.extract_strided_slice %192 {offsets = [0, 0], sizes = [2, 32], strides = [1, 1]} : vector<2x128xf32> to vector<2x32xf32>
    %199 = arith.negf %198 : vector<2x32xf32>
    %200 = math.exp %199 : vector<2x32xf32>
    %cst_49 = arith.constant 1.000000e+00 : f32
    %201 = vector.broadcast %cst_49 : f32 to vector<2x32xf32>
    %202 = arith.addf %201, %200 : vector<2x32xf32>
    %203 = arith.divf %201, %202 : vector<2x32xf32>
    %204 = vector.extract_strided_slice %192 {offsets = [0, 32], sizes = [2, 32], strides = [1, 1]} : vector<2x128xf32> to vector<2x32xf32>
    %205 = arith.negf %204 : vector<2x32xf32>
    %206 = math.exp %205 : vector<2x32xf32>
    %cst_50 = arith.constant 1.000000e+00 : f32
    %207 = vector.broadcast %cst_50 : f32 to vector<2x32xf32>
    %208 = arith.addf %207, %206 : vector<2x32xf32>
    %209 = arith.divf %207, %208 : vector<2x32xf32>
    %210 = vector.extract_strided_slice %192 {offsets = [0, 64], sizes = [2, 32], strides = [1, 1]} : vector<2x128xf32> to vector<2x32xf32>
    %211 = math.tanh %210 : vector<2x32xf32>
    %212 = vector.extract_strided_slice %192 {offsets = [0, 96], sizes = [2, 32], strides = [1, 1]} : vector<2x128xf32> to vector<2x32xf32>
    %213 = arith.negf %212 : vector<2x32xf32>
    %214 = math.exp %213 : vector<2x32xf32>
    %cst_51 = arith.constant 1.000000e+00 : f32
    %215 = vector.broadcast %cst_51 : f32 to vector<2x32xf32>
    %216 = arith.addf %215, %214 : vector<2x32xf32>
    %217 = arith.divf %215, %216 : vector<2x32xf32>
    %218 = arith.mulf %209, %167 : vector<2x32xf32>
    %219 = arith.mulf %203, %211 : vector<2x32xf32>
    %220 = arith.addf %218, %219 : vector<2x32xf32>
    %221 = math.tanh %220 : vector<2x32xf32>
    %222 = arith.mulf %217, %221 : vector<2x32xf32>
    %223 = vector.extract_strided_slice %197 {offsets = [0, 0], sizes = [2, 32], strides = [1, 1]} : vector<2x128xf32> to vector<2x32xf32>
    %224 = arith.negf %223 : vector<2x32xf32>
    %225 = math.exp %224 : vector<2x32xf32>
    %cst_52 = arith.constant 1.000000e+00 : f32
    %226 = vector.broadcast %cst_52 : f32 to vector<2x32xf32>
    %227 = arith.addf %226, %225 : vector<2x32xf32>
    %228 = arith.divf %226, %227 : vector<2x32xf32>
    %229 = vector.extract_strided_slice %197 {offsets = [0, 32], sizes = [2, 32], strides = [1, 1]} : vector<2x128xf32> to vector<2x32xf32>
    %230 = arith.negf %229 : vector<2x32xf32>
    %231 = math.exp %230 : vector<2x32xf32>
    %cst_53 = arith.constant 1.000000e+00 : f32
    %232 = vector.broadcast %cst_53 : f32 to vector<2x32xf32>
    %233 = arith.addf %232, %231 : vector<2x32xf32>
    %234 = arith.divf %232, %233 : vector<2x32xf32>
    %235 = vector.extract_strided_slice %197 {offsets = [0, 64], sizes = [2, 32], strides = [1, 1]} : vector<2x128xf32> to vector<2x32xf32>
    %236 = math.tanh %235 : vector<2x32xf32>
    %237 = vector.extract_strided_slice %197 {offsets = [0, 96], sizes = [2, 32], strides = [1, 1]} : vector<2x128xf32> to vector<2x32xf32>
    %238 = arith.negf %237 : vector<2x32xf32>
    %239 = math.exp %238 : vector<2x32xf32>
    %cst_54 = arith.constant 1.000000e+00 : f32
    %240 = vector.broadcast %cst_54 : f32 to vector<2x32xf32>
    %241 = arith.addf %240, %239 : vector<2x32xf32>
    %242 = arith.divf %240, %241 : vector<2x32xf32>
    %243 = arith.mulf %234, %173 : vector<2x32xf32>
    %244 = arith.mulf %228, %236 : vector<2x32xf32>
    %245 = arith.addf %243, %244 : vector<2x32xf32>
    %246 = math.tanh %245 : vector<2x32xf32>
    %247 = arith.mulf %242, %246 : vector<2x32xf32>
    %248 = vector.shape_cast %185 : vector<2x1xi1> to vector<2x1xi1>
    %249 = vector.broadcast %248 : vector<2x1xi1> to vector<2x32xi1>
    %250 = arith.select %249, %222, %164 : vector<2x32xi1>, vector<2x32xf32>
    %251 = vector.shape_cast %185 : vector<2x1xi1> to vector<2x1xi1>
    %252 = vector.broadcast %251 : vector<2x1xi1> to vector<2x32xi1>
    %253 = arith.select %252, %220, %167 : vector<2x32xi1>, vector<2x32xf32>
    %254 = vector.shape_cast %187 : vector<2x1xi1> to vector<2x1xi1>
    %255 = vector.broadcast %254 : vector<2x1xi1> to vector<2x32xi1>
    %256 = arith.select %255, %247, %170 : vector<2x32xi1>, vector<2x32xf32>
    %257 = vector.shape_cast %187 : vector<2x1xi1> to vector<2x1xi1>
    %258 = vector.broadcast %257 : vector<2x1xi1> to vector<2x32xi1>
    %259 = arith.select %258, %245, %173 : vector<2x32xi1>, vector<2x32xf32>
    %cst_55 = arith.constant 0.000000e+00 : f32
    %260 = vector.shape_cast %185 : vector<2x1xi1> to vector<2x1xi1>
    %261 = vector.broadcast %260 : vector<2x1xi1> to vector<2x32xi1>
    %262 = vector.broadcast %cst_55 : f32 to vector<2x32xf32>
    %263 = arith.select %261, %222, %262 : vector<2x32xi1>, vector<2x32xf32>
    %c4 = arith.constant 4 : index
    %c0_56 = arith.constant 0 : index
    %264 = vector.load %arg7[%c4, %c0_56] : memref<16x64xf32, #tpu.memory_space<vmem>>, vector<2x32xf32>
    tpu.vector_store %arg7[%c4, %c0_56], %263 {strides = array<i32>} : memref<16x64xf32, #tpu.memory_space<vmem>>, vector<2x32xf32>,
    %cst_57 = arith.constant 0.000000e+00 : f32
    %265 = vector.shape_cast %187 : vector<2x1xi1> to vector<2x1xi1>
    %266 = vector.broadcast %265 : vector<2x1xi1> to vector<2x32xi1>
    %267 = vector.broadcast %cst_57 : f32 to vector<2x32xf32>
    %268 = arith.select %266, %247, %267 : vector<2x32xi1>, vector<2x32xf32>
    %c10 = arith.constant 10 : index
    %c32_58 = arith.constant 32 : index
    %269 = vector.load %arg7[%c10, %c32_58] : memref<16x64xf32, #tpu.memory_space<vmem>>, vector<2x32xf32>
    tpu.vector_store %arg7[%c10, %c32_58], %268 {strides = array<i32>} : memref<16x64xf32, #tpu.memory_space<vmem>>, vector<2x32xf32>,
    %cst_59 = arith.constant 3.000000e+00 : f32
    %270 = vector.broadcast %cst_59 : f32 to vector<2x1xf32>
    %271 = arith.cmpf ogt, %0, %270 : vector<2x1xf32>
    %cst_60 = arith.constant 4.000000e+00 : f32
    %272 = vector.broadcast %cst_60 : f32 to vector<2x1xf32>
    %273 = arith.cmpf ogt, %0, %272 : vector<2x1xf32>
    %274 = vector.extract_strided_slice %7 {offsets = [6, 0], sizes = [2, 128], strides = [1, 1]} : vector<16x256xf32> to vector<2x128xf32>
    %cst_61 = arith.constant dense<0.000000e+00> : vector<2x128xf32>
    %275 = tpu.matmul %250, %1, %cst_61 {dimension_numbers = #tpu.dot_dimension_numbers<[1], [0], [0], [1], [0, 0, 1, 1], [], []>} : vector<2x32xf32>, vector<32x128xf32>, vector<2x128xf32> -> vector<2x128xf32>
    %276 = arith.addf %274, %275 : vector<2x128xf32>
    %277 = vector.broadcast %3 : vector<1x128xf32> to vector<2x128xf32>
    %278 = arith.addf %276, %277 : vector<2x128xf32>
    %279 = vector.extract_strided_slice %7 {offsets = [8, 128], sizes = [2, 128], strides = [1, 1]} : vector<16x256xf32> to vector<2x128xf32>
    %cst_62 = arith.constant dense<0.000000e+00> : vector<2x128xf32>
    %280 = tpu.matmul %256, %2, %cst_62 {dimension_numbers = #tpu.dot_dimension_numbers<[1], [0], [0], [1], [0, 0, 1, 1], [], []>} : vector<2x32xf32>, vector<32x128xf32>, vector<2x128xf32> -> vector<2x128xf32>
    %281 = arith.addf %279, %280 : vector<2x128xf32>
    %282 = vector.broadcast %4 : vector<1x128xf32> to vector<2x128xf32>
    %283 = arith.addf %281, %282 : vector<2x128xf32>
    %284 = vector.extract_strided_slice %278 {offsets = [0, 0], sizes = [2, 32], strides = [1, 1]} : vector<2x128xf32> to vector<2x32xf32>
    %285 = arith.negf %284 : vector<2x32xf32>
    %286 = math.exp %285 : vector<2x32xf32>
    %cst_63 = arith.constant 1.000000e+00 : f32
    %287 = vector.broadcast %cst_63 : f32 to vector<2x32xf32>
    %288 = arith.addf %287, %286 : vector<2x32xf32>
    %289 = arith.divf %287, %288 : vector<2x32xf32>
    %290 = vector.extract_strided_slice %278 {offsets = [0, 32], sizes = [2, 32], strides = [1, 1]} : vector<2x128xf32> to vector<2x32xf32>
    %291 = arith.negf %290 : vector<2x32xf32>
    %292 = math.exp %291 : vector<2x32xf32>
    %cst_64 = arith.constant 1.000000e+00 : f32
    %293 = vector.broadcast %cst_64 : f32 to vector<2x32xf32>
    %294 = arith.addf %293, %292 : vector<2x32xf32>
    %295 = arith.divf %293, %294 : vector<2x32xf32>
    %296 = vector.extract_strided_slice %278 {offsets = [0, 64], sizes = [2, 32], strides = [1, 1]} : vector<2x128xf32> to vector<2x32xf32>
    %297 = math.tanh %296 : vector<2x32xf32>
    %298 = vector.extract_strided_slice %278 {offsets = [0, 96], sizes = [2, 32], strides = [1, 1]} : vector<2x128xf32> to vector<2x32xf32>
    %299 = arith.negf %298 : vector<2x32xf32>
    %300 = math.exp %299 : vector<2x32xf32>
    %cst_65 = arith.constant 1.000000e+00 : f32
    %301 = vector.broadcast %cst_65 : f32 to vector<2x32xf32>
    %302 = arith.addf %301, %300 : vector<2x32xf32>
    %303 = arith.divf %301, %302 : vector<2x32xf32>
    %304 = arith.mulf %295, %253 : vector<2x32xf32>
    %305 = arith.mulf %289, %297 : vector<2x32xf32>
    %306 = arith.addf %304, %305 : vector<2x32xf32>
    %307 = math.tanh %306 : vector<2x32xf32>
    %308 = arith.mulf %303, %307 : vector<2x32xf32>
    %309 = vector.extract_strided_slice %283 {offsets = [0, 0], sizes = [2, 32], strides = [1, 1]} : vector<2x128xf32> to vector<2x32xf32>
    %310 = arith.negf %309 : vector<2x32xf32>
    %311 = math.exp %310 : vector<2x32xf32>
    %cst_66 = arith.constant 1.000000e+00 : f32
    %312 = vector.broadcast %cst_66 : f32 to vector<2x32xf32>
    %313 = arith.addf %312, %311 : vector<2x32xf32>
    %314 = arith.divf %312, %313 : vector<2x32xf32>
    %315 = vector.extract_strided_slice %283 {offsets = [0, 32], sizes = [2, 32], strides = [1, 1]} : vector<2x128xf32> to vector<2x32xf32>
    %316 = arith.negf %315 : vector<2x32xf32>
    %317 = math.exp %316 : vector<2x32xf32>
    %cst_67 = arith.constant 1.000000e+00 : f32
    %318 = vector.broadcast %cst_67 : f32 to vector<2x32xf32>
    %319 = arith.addf %318, %317 : vector<2x32xf32>
    %320 = arith.divf %318, %319 : vector<2x32xf32>
    %321 = vector.extract_strided_slice %283 {offsets = [0, 64], sizes = [2, 32], strides = [1, 1]} : vector<2x128xf32> to vector<2x32xf32>
    %322 = math.tanh %321 : vector<2x32xf32>
    %323 = vector.extract_strided_slice %283 {offsets = [0, 96], sizes = [2, 32], strides = [1, 1]} : vector<2x128xf32> to vector<2x32xf32>
    %324 = arith.negf %323 : vector<2x32xf32>
    %325 = math.exp %324 : vector<2x32xf32>
    %cst_68 = arith.constant 1.000000e+00 : f32
    %326 = vector.broadcast %cst_68 : f32 to vector<2x32xf32>
    %327 = arith.addf %326, %325 : vector<2x32xf32>
    %328 = arith.divf %326, %327 : vector<2x32xf32>
    %329 = arith.mulf %320, %259 : vector<2x32xf32>
    %330 = arith.mulf %314, %322 : vector<2x32xf32>
    %331 = arith.addf %329, %330 : vector<2x32xf32>
    %332 = math.tanh %331 : vector<2x32xf32>
    %333 = arith.mulf %328, %332 : vector<2x32xf32>
    %334 = vector.shape_cast %271 : vector<2x1xi1> to vector<2x1xi1>
    %335 = vector.broadcast %334 : vector<2x1xi1> to vector<2x32xi1>
    %336 = arith.select %335, %308, %250 : vector<2x32xi1>, vector<2x32xf32>
    %337 = vector.shape_cast %271 : vector<2x1xi1> to vector<2x1xi1>
    %338 = vector.broadcast %337 : vector<2x1xi1> to vector<2x32xi1>
    %339 = arith.select %338, %306, %253 : vector<2x32xi1>, vector<2x32xf32>
    %340 = vector.shape_cast %273 : vector<2x1xi1> to vector<2x1xi1>
    %341 = vector.broadcast %340 : vector<2x1xi1> to vector<2x32xi1>
    %342 = arith.select %341, %333, %256 : vector<2x32xi1>, vector<2x32xf32>
    %343 = vector.shape_cast %273 : vector<2x1xi1> to vector<2x1xi1>
    %344 = vector.broadcast %343 : vector<2x1xi1> to vector<2x32xi1>
    %345 = arith.select %344, %331, %259 : vector<2x32xi1>, vector<2x32xf32>
    %cst_69 = arith.constant 0.000000e+00 : f32
    %346 = vector.shape_cast %271 : vector<2x1xi1> to vector<2x1xi1>
    %347 = vector.broadcast %346 : vector<2x1xi1> to vector<2x32xi1>
    %348 = vector.broadcast %cst_69 : f32 to vector<2x32xf32>
    %349 = arith.select %347, %308, %348 : vector<2x32xi1>, vector<2x32xf32>
    %c6 = arith.constant 6 : index
    %c0_70 = arith.constant 0 : index
    %350 = vector.load %arg7[%c6, %c0_70] : memref<16x64xf32, #tpu.memory_space<vmem>>, vector<2x32xf32>
    tpu.vector_store %arg7[%c6, %c0_70], %349 {strides = array<i32>} : memref<16x64xf32, #tpu.memory_space<vmem>>, vector<2x32xf32>,
    %cst_71 = arith.constant 0.000000e+00 : f32
    %351 = vector.shape_cast %273 : vector<2x1xi1> to vector<2x1xi1>
    %352 = vector.broadcast %351 : vector<2x1xi1> to vector<2x32xi1>
    %353 = vector.broadcast %cst_71 : f32 to vector<2x32xf32>
    %354 = arith.select %352, %333, %353 : vector<2x32xi1>, vector<2x32xf32>
    %c8 = arith.constant 8 : index
    %c32_72 = arith.constant 32 : index
    %355 = vector.load %arg7[%c8, %c32_72] : memref<16x64xf32, #tpu.memory_space<vmem>>, vector<2x32xf32>
    tpu.vector_store %arg7[%c8, %c32_72], %354 {strides = array<i32>} : memref<16x64xf32, #tpu.memory_space<vmem>>, vector<2x32xf32>,
    %cst_73 = arith.constant 4.000000e+00 : f32
    %356 = vector.broadcast %cst_73 : f32 to vector<2x1xf32>
    %357 = arith.cmpf ogt, %0, %356 : vector<2x1xf32>
    %cst_74 = arith.constant 3.000000e+00 : f32
    %358 = vector.broadcast %cst_74 : f32 to vector<2x1xf32>
    %359 = arith.cmpf ogt, %0, %358 : vector<2x1xf32>
    %360 = vector.extract_strided_slice %7 {offsets = [8, 0], sizes = [2, 128], strides = [1, 1]} : vector<16x256xf32> to vector<2x128xf32>
    %cst_75 = arith.constant dense<0.000000e+00> : vector<2x128xf32>
    %361 = tpu.matmul %336, %1, %cst_75 {dimension_numbers = #tpu.dot_dimension_numbers<[1], [0], [0], [1], [0, 0, 1, 1], [], []>} : vector<2x32xf32>, vector<32x128xf32>, vector<2x128xf32> -> vector<2x128xf32>
    %362 = arith.addf %360, %361 : vector<2x128xf32>
    %363 = vector.broadcast %3 : vector<1x128xf32> to vector<2x128xf32>
    %364 = arith.addf %362, %363 : vector<2x128xf32>
    %365 = vector.extract_strided_slice %7 {offsets = [6, 128], sizes = [2, 128], strides = [1, 1]} : vector<16x256xf32> to vector<2x128xf32>
    %cst_76 = arith.constant dense<0.000000e+00> : vector<2x128xf32>
    %366 = tpu.matmul %342, %2, %cst_76 {dimension_numbers = #tpu.dot_dimension_numbers<[1], [0], [0], [1], [0, 0, 1, 1], [], []>} : vector<2x32xf32>, vector<32x128xf32>, vector<2x128xf32> -> vector<2x128xf32>
    %367 = arith.addf %365, %366 : vector<2x128xf32>
    %368 = vector.broadcast %4 : vector<1x128xf32> to vector<2x128xf32>
    %369 = arith.addf %367, %368 : vector<2x128xf32>
    %370 = vector.extract_strided_slice %364 {offsets = [0, 0], sizes = [2, 32], strides = [1, 1]} : vector<2x128xf32> to vector<2x32xf32>
    %371 = arith.negf %370 : vector<2x32xf32>
    %372 = math.exp %371 : vector<2x32xf32>
    %cst_77 = arith.constant 1.000000e+00 : f32
    %373 = vector.broadcast %cst_77 : f32 to vector<2x32xf32>
    %374 = arith.addf %373, %372 : vector<2x32xf32>
    %375 = arith.divf %373, %374 : vector<2x32xf32>
    %376 = vector.extract_strided_slice %364 {offsets = [0, 32], sizes = [2, 32], strides = [1, 1]} : vector<2x128xf32> to vector<2x32xf32>
    %377 = arith.negf %376 : vector<2x32xf32>
    %378 = math.exp %377 : vector<2x32xf32>
    %cst_78 = arith.constant 1.000000e+00 : f32
    %379 = vector.broadcast %cst_78 : f32 to vector<2x32xf32>
    %380 = arith.addf %379, %378 : vector<2x32xf32>
    %381 = arith.divf %379, %380 : vector<2x32xf32>
    %382 = vector.extract_strided_slice %364 {offsets = [0, 64], sizes = [2, 32], strides = [1, 1]} : vector<2x128xf32> to vector<2x32xf32>
    %383 = math.tanh %382 : vector<2x32xf32>
    %384 = vector.extract_strided_slice %364 {offsets = [0, 96], sizes = [2, 32], strides = [1, 1]} : vector<2x128xf32> to vector<2x32xf32>
    %385 = arith.negf %384 : vector<2x32xf32>
    %386 = math.exp %385 : vector<2x32xf32>
    %cst_79 = arith.constant 1.000000e+00 : f32
    %387 = vector.broadcast %cst_79 : f32 to vector<2x32xf32>
    %388 = arith.addf %387, %386 : vector<2x32xf32>
    %389 = arith.divf %387, %388 : vector<2x32xf32>
    %390 = arith.mulf %381, %339 : vector<2x32xf32>
    %391 = arith.mulf %375, %383 : vector<2x32xf32>
    %392 = arith.addf %390, %391 : vector<2x32xf32>
    %393 = math.tanh %392 : vector<2x32xf32>
    %394 = arith.mulf %389, %393 : vector<2x32xf32>
    %395 = vector.extract_strided_slice %369 {offsets = [0, 0], sizes = [2, 32], strides = [1, 1]} : vector<2x128xf32> to vector<2x32xf32>
    %396 = arith.negf %395 : vector<2x32xf32>
    %397 = math.exp %396 : vector<2x32xf32>
    %cst_80 = arith.constant 1.000000e+00 : f32
    %398 = vector.broadcast %cst_80 : f32 to vector<2x32xf32>
    %399 = arith.addf %398, %397 : vector<2x32xf32>
    %400 = arith.divf %398, %399 : vector<2x32xf32>
    %401 = vector.extract_strided_slice %369 {offsets = [0, 32], sizes = [2, 32], strides = [1, 1]} : vector<2x128xf32> to vector<2x32xf32>
    %402 = arith.negf %401 : vector<2x32xf32>
    %403 = math.exp %402 : vector<2x32xf32>
    %cst_81 = arith.constant 1.000000e+00 : f32
    %404 = vector.broadcast %cst_81 : f32 to vector<2x32xf32>
    %405 = arith.addf %404, %403 : vector<2x32xf32>
    %406 = arith.divf %404, %405 : vector<2x32xf32>
    %407 = vector.extract_strided_slice %369 {offsets = [0, 64], sizes = [2, 32], strides = [1, 1]} : vector<2x128xf32> to vector<2x32xf32>
    %408 = math.tanh %407 : vector<2x32xf32>
    %409 = vector.extract_strided_slice %369 {offsets = [0, 96], sizes = [2, 32], strides = [1, 1]} : vector<2x128xf32> to vector<2x32xf32>
    %410 = arith.negf %409 : vector<2x32xf32>
    %411 = math.exp %410 : vector<2x32xf32>
    %cst_82 = arith.constant 1.000000e+00 : f32
    %412 = vector.broadcast %cst_82 : f32 to vector<2x32xf32>
    %413 = arith.addf %412, %411 : vector<2x32xf32>
    %414 = arith.divf %412, %413 : vector<2x32xf32>
    %415 = arith.mulf %406, %345 : vector<2x32xf32>
    %416 = arith.mulf %400, %408 : vector<2x32xf32>
    %417 = arith.addf %415, %416 : vector<2x32xf32>
    %418 = math.tanh %417 : vector<2x32xf32>
    %419 = arith.mulf %414, %418 : vector<2x32xf32>
    %420 = vector.shape_cast %357 : vector<2x1xi1> to vector<2x1xi1>
    %421 = vector.broadcast %420 : vector<2x1xi1> to vector<2x32xi1>
    %422 = arith.select %421, %394, %336 : vector<2x32xi1>, vector<2x32xf32>
    %423 = vector.shape_cast %357 : vector<2x1xi1> to vector<2x1xi1>
    %424 = vector.broadcast %423 : vector<2x1xi1> to vector<2x32xi1>
    %425 = arith.select %424, %392, %339 : vector<2x32xi1>, vector<2x32xf32>
    %426 = vector.shape_cast %359 : vector<2x1xi1> to vector<2x1xi1>
    %427 = vector.broadcast %426 : vector<2x1xi1> to vector<2x32xi1>
    %428 = arith.select %427, %419, %342 : vector<2x32xi1>, vector<2x32xf32>
    %429 = vector.shape_cast %359 : vector<2x1xi1> to vector<2x1xi1>
    %430 = vector.broadcast %429 : vector<2x1xi1> to vector<2x32xi1>
    %431 = arith.select %430, %417, %345 : vector<2x32xi1>, vector<2x32xf32>
    %cst_83 = arith.constant 0.000000e+00 : f32
    %432 = vector.shape_cast %357 : vector<2x1xi1> to vector<2x1xi1>
    %433 = vector.broadcast %432 : vector<2x1xi1> to vector<2x32xi1>
    %434 = vector.broadcast %cst_83 : f32 to vector<2x32xf32>
    %435 = arith.select %433, %394, %434 : vector<2x32xi1>, vector<2x32xf32>
    %c8_84 = arith.constant 8 : index
    %c0_85 = arith.constant 0 : index
    %436 = vector.load %arg7[%c8_84, %c0_85] : memref<16x64xf32, #tpu.memory_space<vmem>>, vector<2x32xf32>
    tpu.vector_store %arg7[%c8_84, %c0_85], %435 {strides = array<i32>} : memref<16x64xf32, #tpu.memory_space<vmem>>, vector<2x32xf32>,
    %cst_86 = arith.constant 0.000000e+00 : f32
    %437 = vector.shape_cast %359 : vector<2x1xi1> to vector<2x1xi1>
    %438 = vector.broadcast %437 : vector<2x1xi1> to vector<2x32xi1>
    %439 = vector.broadcast %cst_86 : f32 to vector<2x32xf32>
    %440 = arith.select %438, %419, %439 : vector<2x32xi1>, vector<2x32xf32>
    %c6_87 = arith.constant 6 : index
    %c32_88 = arith.constant 32 : index
    %441 = vector.load %arg7[%c6_87, %c32_88] : memref<16x64xf32, #tpu.memory_space<vmem>>, vector<2x32xf32>
    tpu.vector_store %arg7[%c6_87, %c32_88], %440 {strides = array<i32>} : memref<16x64xf32, #tpu.memory_space<vmem>>, vector<2x32xf32>,
    %cst_89 = arith.constant 5.000000e+00 : f32
    %442 = vector.broadcast %cst_89 : f32 to vector<2x1xf32>
    %443 = arith.cmpf ogt, %0, %442 : vector<2x1xf32>
    %cst_90 = arith.constant 2.000000e+00 : f32
    %444 = vector.broadcast %cst_90 : f32 to vector<2x1xf32>
    %445 = arith.cmpf ogt, %0, %444 : vector<2x1xf32>
    %446 = vector.extract_strided_slice %7 {offsets = [10, 0], sizes = [2, 128], strides = [1, 1]} : vector<16x256xf32> to vector<2x128xf32>
    %cst_91 = arith.constant dense<0.000000e+00> : vector<2x128xf32>
    %447 = tpu.matmul %422, %1, %cst_91 {dimension_numbers = #tpu.dot_dimension_numbers<[1], [0], [0], [1], [0, 0, 1, 1], [], []>} : vector<2x32xf32>, vector<32x128xf32>, vector<2x128xf32> -> vector<2x128xf32>
    %448 = arith.addf %446, %447 : vector<2x128xf32>
    %449 = vector.broadcast %3 : vector<1x128xf32> to vector<2x128xf32>
    %450 = arith.addf %448, %449 : vector<2x128xf32>
    %451 = vector.extract_strided_slice %7 {offsets = [4, 128], sizes = [2, 128], strides = [1, 1]} : vector<16x256xf32> to vector<2x128xf32>
    %cst_92 = arith.constant dense<0.000000e+00> : vector<2x128xf32>
    %452 = tpu.matmul %428, %2, %cst_92 {dimension_numbers = #tpu.dot_dimension_numbers<[1], [0], [0], [1], [0, 0, 1, 1], [], []>} : vector<2x32xf32>, vector<32x128xf32>, vector<2x128xf32> -> vector<2x128xf32>
    %453 = arith.addf %451, %452 : vector<2x128xf32>
    %454 = vector.broadcast %4 : vector<1x128xf32> to vector<2x128xf32>
    %455 = arith.addf %453, %454 : vector<2x128xf32>
    %456 = vector.extract_strided_slice %450 {offsets = [0, 0], sizes = [2, 32], strides = [1, 1]} : vector<2x128xf32> to vector<2x32xf32>
    %457 = arith.negf %456 : vector<2x32xf32>
    %458 = math.exp %457 : vector<2x32xf32>
    %cst_93 = arith.constant 1.000000e+00 : f32
    %459 = vector.broadcast %cst_93 : f32 to vector<2x32xf32>
    %460 = arith.addf %459, %458 : vector<2x32xf32>
    %461 = arith.divf %459, %460 : vector<2x32xf32>
    %462 = vector.extract_strided_slice %450 {offsets = [0, 32], sizes = [2, 32], strides = [1, 1]} : vector<2x128xf32> to vector<2x32xf32>
    %463 = arith.negf %462 : vector<2x32xf32>
    %464 = math.exp %463 : vector<2x32xf32>
    %cst_94 = arith.constant 1.000000e+00 : f32
    %465 = vector.broadcast %cst_94 : f32 to vector<2x32xf32>
    %466 = arith.addf %465, %464 : vector<2x32xf32>
    %467 = arith.divf %465, %466 : vector<2x32xf32>
    %468 = vector.extract_strided_slice %450 {offsets = [0, 64], sizes = [2, 32], strides = [1, 1]} : vector<2x128xf32> to vector<2x32xf32>
    %469 = math.tanh %468 : vector<2x32xf32>
    %470 = vector.extract_strided_slice %450 {offsets = [0, 96], sizes = [2, 32], strides = [1, 1]} : vector<2x128xf32> to vector<2x32xf32>
    %471 = arith.negf %470 : vector<2x32xf32>
    %472 = math.exp %471 : vector<2x32xf32>
    %cst_95 = arith.constant 1.000000e+00 : f32
    %473 = vector.broadcast %cst_95 : f32 to vector<2x32xf32>
    %474 = arith.addf %473, %472 : vector<2x32xf32>
    %475 = arith.divf %473, %474 : vector<2x32xf32>
    %476 = arith.mulf %467, %425 : vector<2x32xf32>
    %477 = arith.mulf %461, %469 : vector<2x32xf32>
    %478 = arith.addf %476, %477 : vector<2x32xf32>
    %479 = math.tanh %478 : vector<2x32xf32>
    %480 = arith.mulf %475, %479 : vector<2x32xf32>
    %481 = vector.extract_strided_slice %455 {offsets = [0, 0], sizes = [2, 32], strides = [1, 1]} : vector<2x128xf32> to vector<2x32xf32>
    %482 = arith.negf %481 : vector<2x32xf32>
    %483 = math.exp %482 : vector<2x32xf32>
    %cst_96 = arith.constant 1.000000e+00 : f32
    %484 = vector.broadcast %cst_96 : f32 to vector<2x32xf32>
    %485 = arith.addf %484, %483 : vector<2x32xf32>
    %486 = arith.divf %484, %485 : vector<2x32xf32>
    %487 = vector.extract_strided_slice %455 {offsets = [0, 32], sizes = [2, 32], strides = [1, 1]} : vector<2x128xf32> to vector<2x32xf32>
    %488 = arith.negf %487 : vector<2x32xf32>
    %489 = math.exp %488 : vector<2x32xf32>
    %cst_97 = arith.constant 1.000000e+00 : f32
    %490 = vector.broadcast %cst_97 : f32 to vector<2x32xf32>
    %491 = arith.addf %490, %489 : vector<2x32xf32>
    %492 = arith.divf %490, %491 : vector<2x32xf32>
    %493 = vector.extract_strided_slice %455 {offsets = [0, 64], sizes = [2, 32], strides = [1, 1]} : vector<2x128xf32> to vector<2x32xf32>
    %494 = math.tanh %493 : vector<2x32xf32>
    %495 = vector.extract_strided_slice %455 {offsets = [0, 96], sizes = [2, 32], strides = [1, 1]} : vector<2x128xf32> to vector<2x32xf32>
    %496 = arith.negf %495 : vector<2x32xf32>
    %497 = math.exp %496 : vector<2x32xf32>
    %cst_98 = arith.constant 1.000000e+00 : f32
    %498 = vector.broadcast %cst_98 : f32 to vector<2x32xf32>
    %499 = arith.addf %498, %497 : vector<2x32xf32>
    %500 = arith.divf %498, %499 : vector<2x32xf32>
    %501 = arith.mulf %492, %431 : vector<2x32xf32>
    %502 = arith.mulf %486, %494 : vector<2x32xf32>
    %503 = arith.addf %501, %502 : vector<2x32xf32>
    %504 = math.tanh %503 : vector<2x32xf32>
    %505 = arith.mulf %500, %504 : vector<2x32xf32>
    %506 = vector.shape_cast %443 : vector<2x1xi1> to vector<2x1xi1>
    %507 = vector.broadcast %506 : vector<2x1xi1> to vector<2x32xi1>
    %508 = arith.select %507, %480, %422 : vector<2x32xi1>, vector<2x32xf32>
    %509 = vector.shape_cast %443 : vector<2x1xi1> to vector<2x1xi1>
    %510 = vector.broadcast %509 : vector<2x1xi1> to vector<2x32xi1>
    %511 = arith.select %510, %478, %425 : vector<2x32xi1>, vector<2x32xf32>
    %512 = vector.shape_cast %445 : vector<2x1xi1> to vector<2x1xi1>
    %513 = vector.broadcast %512 : vector<2x1xi1> to vector<2x32xi1>
    %514 = arith.select %513, %505, %428 : vector<2x32xi1>, vector<2x32xf32>
    %515 = vector.shape_cast %445 : vector<2x1xi1> to vector<2x1xi1>
    %516 = vector.broadcast %515 : vector<2x1xi1> to vector<2x32xi1>
    %517 = arith.select %516, %503, %431 : vector<2x32xi1>, vector<2x32xf32>
    %cst_99 = arith.constant 0.000000e+00 : f32
    %518 = vector.shape_cast %443 : vector<2x1xi1> to vector<2x1xi1>
    %519 = vector.broadcast %518 : vector<2x1xi1> to vector<2x32xi1>
    %520 = vector.broadcast %cst_99 : f32 to vector<2x32xf32>
    %521 = arith.select %519, %480, %520 : vector<2x32xi1>, vector<2x32xf32>
    %c10_100 = arith.constant 10 : index
    %c0_101 = arith.constant 0 : index
    %522 = vector.load %arg7[%c10_100, %c0_101] : memref<16x64xf32, #tpu.memory_space<vmem>>, vector<2x32xf32>
    tpu.vector_store %arg7[%c10_100, %c0_101], %521 {strides = array<i32>} : memref<16x64xf32, #tpu.memory_space<vmem>>, vector<2x32xf32>,
    %cst_102 = arith.constant 0.000000e+00 : f32
    %523 = vector.shape_cast %445 : vector<2x1xi1> to vector<2x1xi1>
    %524 = vector.broadcast %523 : vector<2x1xi1> to vector<2x32xi1>
    %525 = vector.broadcast %cst_102 : f32 to vector<2x32xf32>
    %526 = arith.select %524, %505, %525 : vector<2x32xi1>, vector<2x32xf32>
    %c4_103 = arith.constant 4 : index
    %c32_104 = arith.constant 32 : index
    %527 = vector.load %arg7[%c4_103, %c32_104] : memref<16x64xf32, #tpu.memory_space<vmem>>, vector<2x32xf32>
    tpu.vector_store %arg7[%c4_103, %c32_104], %526 {strides = array<i32>} : memref<16x64xf32, #tpu.memory_space<vmem>>, vector<2x32xf32>,
    %cst_105 = arith.constant 6.000000e+00 : f32
    %528 = vector.broadcast %cst_105 : f32 to vector<2x1xf32>
    %529 = arith.cmpf ogt, %0, %528 : vector<2x1xf32>
    %cst_106 = arith.constant 1.000000e+00 : f32
    %530 = vector.broadcast %cst_106 : f32 to vector<2x1xf32>
    %531 = arith.cmpf ogt, %0, %530 : vector<2x1xf32>
    %532 = vector.extract_strided_slice %7 {offsets = [12, 0], sizes = [2, 128], strides = [1, 1]} : vector<16x256xf32> to vector<2x128xf32>
    %cst_107 = arith.constant dense<0.000000e+00> : vector<2x128xf32>
    %533 = tpu.matmul %508, %1, %cst_107 {dimension_numbers = #tpu.dot_dimension_numbers<[1], [0], [0], [1], [0, 0, 1, 1], [], []>} : vector<2x32xf32>, vector<32x128xf32>, vector<2x128xf32> -> vector<2x128xf32>
    %534 = arith.addf %532, %533 : vector<2x128xf32>
    %535 = vector.broadcast %3 : vector<1x128xf32> to vector<2x128xf32>
    %536 = arith.addf %534, %535 : vector<2x128xf32>
    %537 = vector.extract_strided_slice %7 {offsets = [2, 128], sizes = [2, 128], strides = [1, 1]} : vector<16x256xf32> to vector<2x128xf32>
    %cst_108 = arith.constant dense<0.000000e+00> : vector<2x128xf32>
    %538 = tpu.matmul %514, %2, %cst_108 {dimension_numbers = #tpu.dot_dimension_numbers<[1], [0], [0], [1], [0, 0, 1, 1], [], []>} : vector<2x32xf32>, vector<32x128xf32>, vector<2x128xf32> -> vector<2x128xf32>
    %539 = arith.addf %537, %538 : vector<2x128xf32>
    %540 = vector.broadcast %4 : vector<1x128xf32> to vector<2x128xf32>
    %541 = arith.addf %539, %540 : vector<2x128xf32>
    %542 = vector.extract_strided_slice %536 {offsets = [0, 0], sizes = [2, 32], strides = [1, 1]} : vector<2x128xf32> to vector<2x32xf32>
    %543 = arith.negf %542 : vector<2x32xf32>
    %544 = math.exp %543 : vector<2x32xf32>
    %cst_109 = arith.constant 1.000000e+00 : f32
    %545 = vector.broadcast %cst_109 : f32 to vector<2x32xf32>
    %546 = arith.addf %545, %544 : vector<2x32xf32>
    %547 = arith.divf %545, %546 : vector<2x32xf32>
    %548 = vector.extract_strided_slice %536 {offsets = [0, 32], sizes = [2, 32], strides = [1, 1]} : vector<2x128xf32> to vector<2x32xf32>
    %549 = arith.negf %548 : vector<2x32xf32>
    %550 = math.exp %549 : vector<2x32xf32>
    %cst_110 = arith.constant 1.000000e+00 : f32
    %551 = vector.broadcast %cst_110 : f32 to vector<2x32xf32>
    %552 = arith.addf %551, %550 : vector<2x32xf32>
    %553 = arith.divf %551, %552 : vector<2x32xf32>
    %554 = vector.extract_strided_slice %536 {offsets = [0, 64], sizes = [2, 32], strides = [1, 1]} : vector<2x128xf32> to vector<2x32xf32>
    %555 = math.tanh %554 : vector<2x32xf32>
    %556 = vector.extract_strided_slice %536 {offsets = [0, 96], sizes = [2, 32], strides = [1, 1]} : vector<2x128xf32> to vector<2x32xf32>
    %557 = arith.negf %556 : vector<2x32xf32>
    %558 = math.exp %557 : vector<2x32xf32>
    %cst_111 = arith.constant 1.000000e+00 : f32
    %559 = vector.broadcast %cst_111 : f32 to vector<2x32xf32>
    %560 = arith.addf %559, %558 : vector<2x32xf32>
    %561 = arith.divf %559, %560 : vector<2x32xf32>
    %562 = arith.mulf %553, %511 : vector<2x32xf32>
    %563 = arith.mulf %547, %555 : vector<2x32xf32>
    %564 = arith.addf %562, %563 : vector<2x32xf32>
    %565 = math.tanh %564 : vector<2x32xf32>
    %566 = arith.mulf %561, %565 : vector<2x32xf32>
    %567 = vector.extract_strided_slice %541 {offsets = [0, 0], sizes = [2, 32], strides = [1, 1]} : vector<2x128xf32> to vector<2x32xf32>
    %568 = arith.negf %567 : vector<2x32xf32>
    %569 = math.exp %568 : vector<2x32xf32>
    %cst_112 = arith.constant 1.000000e+00 : f32
    %570 = vector.broadcast %cst_112 : f32 to vector<2x32xf32>
    %571 = arith.addf %570, %569 : vector<2x32xf32>
    %572 = arith.divf %570, %571 : vector<2x32xf32>
    %573 = vector.extract_strided_slice %541 {offsets = [0, 32], sizes = [2, 32], strides = [1, 1]} : vector<2x128xf32> to vector<2x32xf32>
    %574 = arith.negf %573 : vector<2x32xf32>
    %575 = math.exp %574 : vector<2x32xf32>
    %cst_113 = arith.constant 1.000000e+00 : f32
    %576 = vector.broadcast %cst_113 : f32 to vector<2x32xf32>
    %577 = arith.addf %576, %575 : vector<2x32xf32>
    %578 = arith.divf %576, %577 : vector<2x32xf32>
    %579 = vector.extract_strided_slice %541 {offsets = [0, 64], sizes = [2, 32], strides = [1, 1]} : vector<2x128xf32> to vector<2x32xf32>
    %580 = math.tanh %579 : vector<2x32xf32>
    %581 = vector.extract_strided_slice %541 {offsets = [0, 96], sizes = [2, 32], strides = [1, 1]} : vector<2x128xf32> to vector<2x32xf32>
    %582 = arith.negf %581 : vector<2x32xf32>
    %583 = math.exp %582 : vector<2x32xf32>
    %cst_114 = arith.constant 1.000000e+00 : f32
    %584 = vector.broadcast %cst_114 : f32 to vector<2x32xf32>
    %585 = arith.addf %584, %583 : vector<2x32xf32>
    %586 = arith.divf %584, %585 : vector<2x32xf32>
    %587 = arith.mulf %578, %517 : vector<2x32xf32>
    %588 = arith.mulf %572, %580 : vector<2x32xf32>
    %589 = arith.addf %587, %588 : vector<2x32xf32>
    %590 = math.tanh %589 : vector<2x32xf32>
    %591 = arith.mulf %586, %590 : vector<2x32xf32>
    %592 = vector.shape_cast %529 : vector<2x1xi1> to vector<2x1xi1>
    %593 = vector.broadcast %592 : vector<2x1xi1> to vector<2x32xi1>
    %594 = arith.select %593, %566, %508 : vector<2x32xi1>, vector<2x32xf32>
    %595 = vector.shape_cast %529 : vector<2x1xi1> to vector<2x1xi1>
    %596 = vector.broadcast %595 : vector<2x1xi1> to vector<2x32xi1>
    %597 = arith.select %596, %564, %511 : vector<2x32xi1>, vector<2x32xf32>
    %598 = vector.shape_cast %531 : vector<2x1xi1> to vector<2x1xi1>
    %599 = vector.broadcast %598 : vector<2x1xi1> to vector<2x32xi1>
    %600 = arith.select %599, %591, %514 : vector<2x32xi1>, vector<2x32xf32>
    %601 = vector.shape_cast %531 : vector<2x1xi1> to vector<2x1xi1>
    %602 = vector.broadcast %601 : vector<2x1xi1> to vector<2x32xi1>
    %603 = arith.select %602, %589, %517 : vector<2x32xi1>, vector<2x32xf32>
    %cst_115 = arith.constant 0.000000e+00 : f32
    %604 = vector.shape_cast %529 : vector<2x1xi1> to vector<2x1xi1>
    %605 = vector.broadcast %604 : vector<2x1xi1> to vector<2x32xi1>
    %606 = vector.broadcast %cst_115 : f32 to vector<2x32xf32>
    %607 = arith.select %605, %566, %606 : vector<2x32xi1>, vector<2x32xf32>
    %c12_116 = arith.constant 12 : index
    %c0_117 = arith.constant 0 : index
    %608 = vector.load %arg7[%c12_116, %c0_117] : memref<16x64xf32, #tpu.memory_space<vmem>>, vector<2x32xf32>
    tpu.vector_store %arg7[%c12_116, %c0_117], %607 {strides = array<i32>} : memref<16x64xf32, #tpu.memory_space<vmem>>, vector<2x32xf32>,
    %cst_118 = arith.constant 0.000000e+00 : f32
    %609 = vector.shape_cast %531 : vector<2x1xi1> to vector<2x1xi1>
    %610 = vector.broadcast %609 : vector<2x1xi1> to vector<2x32xi1>
    %611 = vector.broadcast %cst_118 : f32 to vector<2x32xf32>
    %612 = arith.select %610, %591, %611 : vector<2x32xi1>, vector<2x32xf32>
    %c2_119 = arith.constant 2 : index
    %c32_120 = arith.constant 32 : index
    %613 = vector.load %arg7[%c2_119, %c32_120] : memref<16x64xf32, #tpu.memory_space<vmem>>, vector<2x32xf32>
    tpu.vector_store %arg7[%c2_119, %c32_120], %612 {strides = array<i32>} : memref<16x64xf32, #tpu.memory_space<vmem>>, vector<2x32xf32>,
    %cst_121 = arith.constant 7.000000e+00 : f32
    %614 = vector.broadcast %cst_121 : f32 to vector<2x1xf32>
    %615 = arith.cmpf ogt, %0, %614 : vector<2x1xf32>
    %cst_122 = arith.constant 0.000000e+00 : f32
    %616 = vector.broadcast %cst_122 : f32 to vector<2x1xf32>
    %617 = arith.cmpf ogt, %0, %616 : vector<2x1xf32>
    %618 = vector.extract_strided_slice %7 {offsets = [14, 0], sizes = [2, 128], strides = [1, 1]} : vector<16x256xf32> to vector<2x128xf32>
    %cst_123 = arith.constant dense<0.000000e+00> : vector<2x128xf32>
    %619 = tpu.matmul %594, %1, %cst_123 {dimension_numbers = #tpu.dot_dimension_numbers<[1], [0], [0], [1], [0, 0, 1, 1], [], []>} : vector<2x32xf32>, vector<32x128xf32>, vector<2x128xf32> -> vector<2x128xf32>
    %620 = arith.addf %618, %619 : vector<2x128xf32>
    %621 = vector.broadcast %3 : vector<1x128xf32> to vector<2x128xf32>
    %622 = arith.addf %620, %621 : vector<2x128xf32>
    %623 = vector.extract_strided_slice %7 {offsets = [0, 128], sizes = [2, 128], strides = [1, 1]} : vector<16x256xf32> to vector<2x128xf32>
    %cst_124 = arith.constant dense<0.000000e+00> : vector<2x128xf32>
    %624 = tpu.matmul %600, %2, %cst_124 {dimension_numbers = #tpu.dot_dimension_numbers<[1], [0], [0], [1], [0, 0, 1, 1], [], []>} : vector<2x32xf32>, vector<32x128xf32>, vector<2x128xf32> -> vector<2x128xf32>
    %625 = arith.addf %623, %624 : vector<2x128xf32>
    %626 = vector.broadcast %4 : vector<1x128xf32> to vector<2x128xf32>
    %627 = arith.addf %625, %626 : vector<2x128xf32>
    %628 = vector.extract_strided_slice %622 {offsets = [0, 0], sizes = [2, 32], strides = [1, 1]} : vector<2x128xf32> to vector<2x32xf32>
    %629 = arith.negf %628 : vector<2x32xf32>
    %630 = math.exp %629 : vector<2x32xf32>
    %cst_125 = arith.constant 1.000000e+00 : f32
    %631 = vector.broadcast %cst_125 : f32 to vector<2x32xf32>
    %632 = arith.addf %631, %630 : vector<2x32xf32>
    %633 = arith.divf %631, %632 : vector<2x32xf32>
    %634 = vector.extract_strided_slice %622 {offsets = [0, 32], sizes = [2, 32], strides = [1, 1]} : vector<2x128xf32> to vector<2x32xf32>
    %635 = arith.negf %634 : vector<2x32xf32>
    %636 = math.exp %635 : vector<2x32xf32>
    %cst_126 = arith.constant 1.000000e+00 : f32
    %637 = vector.broadcast %cst_126 : f32 to vector<2x32xf32>
    %638 = arith.addf %637, %636 : vector<2x32xf32>
    %639 = arith.divf %637, %638 : vector<2x32xf32>
    %640 = vector.extract_strided_slice %622 {offsets = [0, 64], sizes = [2, 32], strides = [1, 1]} : vector<2x128xf32> to vector<2x32xf32>
    %641 = math.tanh %640 : vector<2x32xf32>
    %642 = vector.extract_strided_slice %622 {offsets = [0, 96], sizes = [2, 32], strides = [1, 1]} : vector<2x128xf32> to vector<2x32xf32>
    %643 = arith.negf %642 : vector<2x32xf32>
    %644 = math.exp %643 : vector<2x32xf32>
    %cst_127 = arith.constant 1.000000e+00 : f32
    %645 = vector.broadcast %cst_127 : f32 to vector<2x32xf32>
    %646 = arith.addf %645, %644 : vector<2x32xf32>
    %647 = arith.divf %645, %646 : vector<2x32xf32>
    %648 = arith.mulf %639, %597 : vector<2x32xf32>
    %649 = arith.mulf %633, %641 : vector<2x32xf32>
    %650 = arith.addf %648, %649 : vector<2x32xf32>
    %651 = math.tanh %650 : vector<2x32xf32>
    %652 = arith.mulf %647, %651 : vector<2x32xf32>
    %653 = vector.extract_strided_slice %627 {offsets = [0, 0], sizes = [2, 32], strides = [1, 1]} : vector<2x128xf32> to vector<2x32xf32>
    %654 = arith.negf %653 : vector<2x32xf32>
    %655 = math.exp %654 : vector<2x32xf32>
    %cst_128 = arith.constant 1.000000e+00 : f32
    %656 = vector.broadcast %cst_128 : f32 to vector<2x32xf32>
    %657 = arith.addf %656, %655 : vector<2x32xf32>
    %658 = arith.divf %656, %657 : vector<2x32xf32>
    %659 = vector.extract_strided_slice %627 {offsets = [0, 32], sizes = [2, 32], strides = [1, 1]} : vector<2x128xf32> to vector<2x32xf32>
    %660 = arith.negf %659 : vector<2x32xf32>
    %661 = math.exp %660 : vector<2x32xf32>
    %cst_129 = arith.constant 1.000000e+00 : f32
    %662 = vector.broadcast %cst_129 : f32 to vector<2x32xf32>
    %663 = arith.addf %662, %661 : vector<2x32xf32>
    %664 = arith.divf %662, %663 : vector<2x32xf32>
    %665 = vector.extract_strided_slice %627 {offsets = [0, 64], sizes = [2, 32], strides = [1, 1]} : vector<2x128xf32> to vector<2x32xf32>
    %666 = math.tanh %665 : vector<2x32xf32>
    %667 = vector.extract_strided_slice %627 {offsets = [0, 96], sizes = [2, 32], strides = [1, 1]} : vector<2x128xf32> to vector<2x32xf32>
    %668 = arith.negf %667 : vector<2x32xf32>
    %669 = math.exp %668 : vector<2x32xf32>
    %cst_130 = arith.constant 1.000000e+00 : f32
    %670 = vector.broadcast %cst_130 : f32 to vector<2x32xf32>
    %671 = arith.addf %670, %669 : vector<2x32xf32>
    %672 = arith.divf %670, %671 : vector<2x32xf32>
    %673 = arith.mulf %664, %603 : vector<2x32xf32>
    %674 = arith.mulf %658, %666 : vector<2x32xf32>
    %675 = arith.addf %673, %674 : vector<2x32xf32>
    %676 = math.tanh %675 : vector<2x32xf32>
    %677 = arith.mulf %672, %676 : vector<2x32xf32>
    %cst_131 = arith.constant 0.000000e+00 : f32
    %678 = vector.shape_cast %615 : vector<2x1xi1> to vector<2x1xi1>
    %679 = vector.broadcast %678 : vector<2x1xi1> to vector<2x32xi1>
    %680 = vector.broadcast %cst_131 : f32 to vector<2x32xf32>
    %681 = arith.select %679, %652, %680 : vector<2x32xi1>, vector<2x32xf32>
    %c14_132 = arith.constant 14 : index
    %c0_133 = arith.constant 0 : index
    %682 = vector.load %arg7[%c14_132, %c0_133] : memref<16x64xf32, #tpu.memory_space<vmem>>, vector<2x32xf32>
    tpu.vector_store %arg7[%c14_132, %c0_133], %681 {strides = array<i32>} : memref<16x64xf32, #tpu.memory_space<vmem>>, vector<2x32xf32>,
    %cst_134 = arith.constant 0.000000e+00 : f32
    %683 = vector.shape_cast %617 : vector<2x1xi1> to vector<2x1xi1>
    %684 = vector.broadcast %683 : vector<2x1xi1> to vector<2x32xi1>
    %685 = vector.broadcast %cst_134 : f32 to vector<2x32xf32>
    %686 = arith.select %684, %677, %685 : vector<2x32xi1>, vector<2x32xf32>
    %c0_135 = arith.constant 0 : index
    %c32_136 = arith.constant 32 : index
    %687 = vector.load %arg7[%c0_135, %c32_136] : memref<16x64xf32, #tpu.memory_space<vmem>>, vector<2x32xf32>
    tpu.vector_store %arg7[%c0_135, %c32_136], %686 {strides = array<i32>} : memref<16x64xf32, #tpu.memory_space<vmem>>, vector<2x32xf32>,
    return
  }
}

</mosaic_0001>

<bundles_post_ra>
// kernel: tpu_custom_call.1
= control target key start
LH: loop header
LB: loop body
LE: loop exit
PB: predicated region body
PF: predicated region fallthrough
CT: control target
= control target key end

     0   :  { %12 = vsyncpa [#allocation3], 0  ;;  %s3529_s0 = inlined_call_operand.hbm [shape: f32[16,32], index: 0, kind: input, shape index: {}]   ;;  %s3530_s1 = inlined_call_operand.vmem [shape: f32[2,1], index: 1, kind: input, shape index: {}]   ;;  %s3531_s2 = inlined_call_operand.hbm [shape: f32[32,256], index: 2, kind: input, shape index: {}]   ;;  %s3532_s3 = inlined_call_operand.hbm [shape: f32[32,128], index: 3, kind: input, shape index: {}]   ;;  %s3533_s4 = inlined_call_operand.hbm [shape: f32[32,128], index: 4, kind: input, shape index: {}]   ;;  %s3534_s5 = inlined_call_operand.vmem [shape: f32[1,128], index: 5, kind: input, shape index: {}]   ;;  %s3535_s6 = inlined_call_operand.vmem [shape: f32[1,128], index: 6, kind: input, shape index: {}]   ;;  %s3536_s7 = inlined_call_operand.hbm [shape: f32[16,64], index: 7, kind: output, shape index: {}]  }
   0x1   :  { %13 = vsyncpa [#allocation6], 0 }
   0x2   :  { %14 = vsyncpa [#allocation9], 0 }
   0x3   :  { %15 = vsyncpa [#allocation4], 0  ;;  %s2838_s24 = smov [#allocation5]   ;;  %s2720_s28 = scalar_lea.hbm %s3531_s2, 1024 }
   0x4   :  { %s35_s25 = sshll.u32 %s2838_s24, 4  ;;  %p2721_p0 = scmp.ne.s32.totalorder %s3531_s2, %s2720_s28  ;;  %s36_s25 = int_to_ptr.vmem [resolvable:$true] %s35_s25 }
   0x5   :  { %p2724_p1 = scmp.lt.u32.totalorder %s2720_s28, %s3531_s2 }
   0x7   :  { %p2726_p2 = pnand %p2724_p1, %p2721_p0 }
   0x9   :  { %2729 = shalt.err (!%p2726_p2)
}
   0xa   :  { %s2730_s10 = scalar_lea.vmem %s36_s25, 1024  ;;  %p2735_p4 = scmp.lt.s32.totalorder %s36_s25, %s36_s25 }
   0xb   :  { %p2731_p3 = scmp.ne.s32.totalorder %s36_s25, %s2730_s10  ;;  %p2736_p5 = scmp.lt.s32.totalorder %s2730_s10, %s2730_s10 }
   0xd   :  { %p2737_p6 = por %p2736_p5, %p2735_p4 }
   0xf   :  { %p2738_p7 = pnand %p2737_p6, %p2731_p3 }
  0x11   :  { %2741 = shalt.err (!%p2738_p7)
}
  0x12   :  { %s2839_s11 = smov 256   ;;  %s2840_s12 = smov 16  }
  0x13   :  { %41 = dma.hbm_to_vmem [thread:$0]  %s3531_s2, 1024, %s36_s25, [#allocation6], %s2839_s11, %s2839_s11, %s2840_s12  }
  0x14   :  { %s2841_s15 = smov [#allocation2]   ;;  %s2742_s19 = scalar_lea.hbm %s3529_s0, 256 }
  0x15   :  { %s21_s16 = sshll.u32 %s2841_s15, 4  ;;  %p2743_p8 = scmp.ne.s32.totalorder %s3529_s0, %s2742_s19  ;;  %s22_s16 = int_to_ptr.vmem [resolvable:$true] %s21_s16 }
  0x16   :  { %p2746_p9 = scmp.lt.u32.totalorder %s2742_s19, %s3529_s0 }
  0x18   :  { %p2748_p10 = pnand %p2746_p9, %p2743_p8 }
  0x1a   :  { %2751 = shalt.err (!%p2748_p10)
}
  0x1b   :  { %s2752_s24 = scalar_lea.vmem %s22_s16, 256  ;;  %p2757_p12 = scmp.lt.s32.totalorder %s22_s16, %s22_s16 }
  0x1c   :  { %p2753_p11 = scmp.ne.s32.totalorder %s22_s16, %s2752_s24  ;;  %p2758_p13 = scmp.lt.s32.totalorder %s2752_s24, %s2752_s24 }
  0x1e   :  { %p2759_p0 = por %p2758_p13, %p2757_p12 }
  0x20   :  { %p2760_p1 = pnand %p2759_p0, %p2753_p11 }
  0x22   :  { %2763 = shalt.err (!%p2760_p1)
}
  0x23   :  { %s2842_s2 = smov 128   ;;  %s2843_s25 = smov 8  }
  0x24   :  { %27 = dma.hbm_to_vmem [thread:$0]  %s3529_s0, 256, %s22_s16, [#allocation3], %s2842_s2, %s2842_s2, %s2843_s25  }
  0x25   :  { %s2844_s28 = smov [#allocation7]   ;;  %s2845_s30 = smov [#allocation8]  }
  0x26   :  { %s47_s29 = sshll.u32 %s2844_s28, 4  ;;  %s59_s8 = sshll.u32 %s2845_s30, 4  ;;  %s48_s29 = int_to_ptr.vmem [resolvable:$true] %s47_s29  ;;  %s2921_s8 = int_to_ptr.vmem [resolvable:$true] %s59_s8 }
  0x27   :  { %s2764_s11 = scalar_lea.hbm %s3532_s3, 512 }
  0x28   :  { %p2765_p2 = scmp.ne.s32.totalorder %s3532_s3, %s2764_s11  ;;  %p2768_p3 = scmp.lt.u32.totalorder %s2764_s11, %s3532_s3 }
  0x2a   :  { %p2770_p4 = pnand %p2768_p3, %p2765_p2 }
  0x2c   :  { %2773 = shalt.err (!%p2770_p4)
}
  0x2d   :  { %s2774_s0 = scalar_lea.vmem %s48_s29, 512  ;;  %p2779_p6 = scmp.lt.s32.totalorder %s48_s29, %s48_s29 }
  0x2e   :  { %p2775_p5 = scmp.ne.s32.totalorder %s48_s29, %s2774_s0  ;;  %p2780_p7 = scmp.lt.s32.totalorder %s2774_s0, %s2774_s0 }
  0x30   :  { %p2781_p8 = por %p2780_p7, %p2779_p6 }
  0x32   :  { %p2782_p9 = pnand %p2781_p8, %p2775_p5 }
  0x34   :  { %2785 = shalt.err (!%p2782_p9)
}
  0x35   :  { %53 = dma.hbm_to_vmem [thread:$0]  %s3532_s3, 512, %s48_s29, [#allocation6], %s2842_s2, %s2842_s2, %s2843_s25  }
  0x36   :  { %s2786_s20 = scalar_lea.hbm %s3533_s4, 512 }
  0x37   :  { %p2787_p10 = scmp.ne.s32.totalorder %s3533_s4, %s2786_s20  ;;  %p2790_p11 = scmp.lt.u32.totalorder %s2786_s20, %s3533_s4 }
  0x39   :  { %p2792_p12 = pnand %p2790_p11, %p2787_p10 }
  0x3b   :  { %2795 = shalt.err (!%p2792_p12)
}
  0x3c   :  { %s2796_s26 = scalar_lea.vmem %s2921_s8, 512  ;;  %p2801_p0 = scmp.lt.s32.totalorder %s2921_s8, %s2921_s8 }
  0x3d   :  { %p2797_p13 = scmp.ne.s32.totalorder %s2921_s8, %s2796_s26  ;;  %p2802_p1 = scmp.lt.s32.totalorder %s2796_s26, %s2796_s26 }
  0x3f   :  { %p2803_p2 = por %p2802_p1, %p2801_p0 }
  0x41   :  { %p2804_p3 = pnand %p2803_p2, %p2797_p13 }
  0x43   :  { %2807 = shalt.err (!%p2804_p3)
}
  0x44   :  { %65 = dma.hbm_to_vmem [thread:$0]  %s3533_s4, 512, %s2921_s8, [#allocation9], %s2842_s2, %s2842_s2, %s2843_s25  }
  0x45   :  { %2830 = dma.done.wait [#allocation3], 256  }
  0x46   :  { %2831 = vsyncadd [#allocation3], 4294967040 }
  0x47   :  { %2832 = dma.done.wait [#allocation6], 1536  }
  0x48   :  { %2833 = vsyncadd [#allocation6], 4294965760 }
  0x49   :  { %2834 = dma.done.wait [#allocation9], 512  }
  0x4a   :  { %2835 = vsyncadd [#allocation9], 4294966784  ;;  %v2846_v0 = vmov 0.0|0.0   ;;  %v2847_v1 = vmov 0.0   ;;  %vm2848_vm0 = vmmov 0   ;;  %v96_v2 = vld [vmem:[#allocation5 + $0x8] sm:$0xff] }
  0x4b   :  { %2476 = vmatprep.subr.bf16.mxu1 %v2846_v0  ;;  %174 = vmatprep.mubr.f32.mxu0 %v2847_v1  ;;  %v98_v3 = vld [vmem:[#allocation5 + $0x18] sm:$0xff]  ;;  %v95_v4 = vld [vmem:[#allocation5] sm:$0xff]  ;;  %v97_v6 = vld [vmem:[#allocation5 + $0x10] sm:$0xff]  ;;  %vm103_vm1 = vcmask 261120   ;;  %v2849_v28 = vmov 0   ;;  %s2850_s8 = smov 64  }
  0x4c   :  { %2300 = vmatprep.mubr.msk.f32.mxu1 %vm2848_vm0, %v2847_v1  ;;  %v2468_v5 = vpack.c.bf16 %v98_v3, %v96_v2  ;;  %v83_v7 = vld [vmem:[#allocation7] sm:$0xff]  ;;  %v84_v8 = vld [vmem:[#allocation7 + $0x8] sm:$0xff]  ;;  %v2470_v9 = vpack.c.bf16 %v97_v6, %v95_v4  ;;  %v102_v12 = vld [vmem:[#allocation5 + $0x38] sm:$0xff]  ;;  %2588 = vset.pattern.permute.xlu0 %v2849_v28  ;;  %s2852_s11 = smov 96   ;;  %vm427_vm5 = vcmask 254976  }
  0x4d   :  { %v2962_v10 = vpack.c.bf16 %v84_v8, %v83_v7  ;;  %v100_v11 = vld [vmem:[#allocation5 + $0x28] sm:$0xff]  ;;  %v99_v13 = vld [vmem:[#allocation5 + $0x20] sm:$0xff]  ;;  %v101_v15 = vld [vmem:[#allocation5 + $0x30] sm:$0xff]  ;;  %2589 = vset.pattern.permute.xlu1 %v2849_v28 }
  0x4e   :  { %2469 = vmatprep.subr.bf16.mxu0 %v2468_v5  ;;  %v2472_v14 = vpack.c.bf16 %v102_v12, %v100_v11  ;;  %v85_v16 = vld [vmem:[#allocation7 + $0x10] sm:$0xff]  ;;  %v86_v17 = vld [vmem:[#allocation7 + $0x18] sm:$0xff]  ;;  %v2474_v18 = vpack.c.bf16 %v101_v15, %v99_v13  ;;  %v87_v20 = vld [vmem:[#allocation8] sm:$0xff] }
  0x4f   :  { %2471 = vmatpush1.bf16.msra.mxu0 %v2470_v9  ;;  %2478 = vmatpush3.bf16.msra.mxu1 %v2962_v10  ;;  %v2965_v19 = vpack.c.bf16 %v86_v17, %v85_v16  ;;  %v88_v21 = vld [vmem:[#allocation8 + $0x8] sm:$0xff]  ;;  %v93_v22 = vld [vmem:[#allocation2] sm:$0xff]  ;;  %v90_v25 = vld [vmem:[#allocation8 + $0x18] sm:$0xff] }
  0x50   :  { %2473 = vmatprep.subr.bf16.mxu0 %v2472_v14  ;;  %2479 = vmatprep.subr.bf16.mxu1 %v2846_v0  ;;  %v2969_v23 = vpack.c.bf16 %v88_v21, %v87_v20  ;;  %v89_v24 = vld [vmem:[#allocation8 + $0x10] sm:$0xff]  ;;  %v94_v26 = vld [vmem:[#allocation2 + $0x8] sm:$0xff] }
  0x51   :  { %v2977_v27 = vpack.c.bf16 %v90_v25, %v89_v24  ;;  %v3005_v30 = vld [vmem:[%s3534_s5] ss:$0 sm:$0xff] }
  0x52   :  { %v3018_v41 = vld [vmem:[%s3535_s6] ss:$0 sm:$0xff] }
  0x53   :  { %2475 = vmatpush1.bf16.msra.mxu0 %v2474_v18  ;;  %2481 = vmatpush3.bf16.msra.mxu1 %v2965_v19  ;;  %v3026_v45 = vld [vmem:[%s3530_s1] sm:$0x3]  ;;  %s2851_s1 = smov 32  }
  0x54   :  { %2482 = vmatprep.subr.bf16.mxu0 %v2846_v0  ;;  %2488 = vmatprep.subr.bf16.mxu1 %v2846_v0  ;;  %vm187_vm2 = vcmp.gt.f32.partialorder %v3026_v45, 0.0  ;;  %vm188_vm3 = vcmp.gt.f32.partialorder %v3026_v45, 7.0  ;;  %vm435_vm7 = vcmp.gt.f32.partialorder %v3026_v45, 1.0  ;;  %vm436_vm8 = vcmp.gt.f32.partialorder %v3026_v45, 6.0 }
  0x55   :  { %v399_v47 = vsel %vm187_vm2, 1, %v2849_v28  ;;  %v406_v53 = vsel %vm188_vm3, 1, %v2849_v28  ;;  %vm692_vm11 = vcmp.gt.f32.partialorder %v3026_v45, 2.0  ;;  %vm693_vm12 = vcmp.gt.f32.partialorder %v3026_v45, 5.0 }
  0x56   :  { %2178 = vmatmul.mubr.msk.f32.vlgmr.msra.gmra.mrb[0].mxu0 %vm103_vm1, %v93_v22  ;;  %2301 = vmatmul.mubr.f32.vlgmr.msra.gmra.mrb[0].mxu1 %v2847_v1  ;;  %vm951_vm15 = vcmp.gt.f32.partialorder %v3026_v45, 4.0  ;;  %vm950_vm2 = vcmp.gt.f32.partialorder %v3026_v45, 3.0 }
  0x57   :  { %2484 = vmatpush3.bf16.msra.mxu0 %v2969_v23  ;;  %180 = vmatprep.mubr.f32.mxu0 %v2847_v1 }
  0x58   :  { %2485 = vmatprep.subr.bf16.mxu0 %v2846_v0  ;;  %2490 = vmatpush3.bf16.msra.mxu1 %v2962_v10 }
  0x59   :  { %2491 = vmatprep.subr.bf16.mxu1 %v2846_v0  ;;  %2322 = vmatprep.mubr.msk.f32.mxu1 %vm2848_vm0, %v2847_v1 }
  0x5a   :  { %2179 = vmatmul.mubr.msk.f32.gmra.mrb[2].mxu0 %vm103_vm1, %v94_v26 }
  0x5b   :  { %2487 = vmatpush3.bf16.msra.mxu0 %v2977_v27  ;;  %2311 = vmatprep.mubr.msk.f32.mxu0 %vm2848_vm0, %v2847_v1 }
  0x5c   :  { %2493 = vmatpush3.bf16.msra.mxu1 %v2965_v19  ;;  %2494 = vmatprep.subr.bf16.mxu0 %v2846_v0 }
  0x5d   :  { %2500 = vmatprep.subr.bf16.mxu1 %v2846_v0 }
  0x5e   :  { %2312 = vmatmul.mubr.f32.vlgmr.msra.gmra.mrb[4].mxu0 %v2847_v1 }
  0x5f   :  { %2496 = vmatpush3.bf16.msra.mxu0 %v2969_v23  ;;  %2333 = vmatprep.mubr.msk.f32.mxu0 %vm2848_vm0, %v2847_v1 }
  0x60   :  { %2497 = vmatprep.subr.bf16.mxu0 %v2846_v0 }
  0x63   :  { %2499 = vmatpush3.bf16.msra.mxu0 %v2977_v27 }
  0x64   :  { %2506 = vmatprep.subr.bf16.mxu0 %v2846_v0 }
 0x129   :  { %v3000_v29 = vpop.f32.mrb[0].mxu0  ;;  %v258_v31 = vpop.f32.mrb[0].mxu1 }
 0x12a   :  { %v262_v32 = vadd.f32 %v258_v31, %v3000_v29  ;;  %v3008_v33 = vpop.f32.mrb[1].mxu0  ;;  %v2302_v34 = vpop.f32.mrb[1].mxu1 }
 0x12c   :  { %v269_v35 = vadd.f32 %v3005_v30, %v262_v32 }
 0x12d   :  { %v3011_v36 = vpop.f32.mrb[2].mxu0 }
 0x12e   :  { %2590 = vtanh.f32 %v269_v35  ;;  %v3013_v37 = vpop.f32.mrb[3].mxu0  ;;  %v2182_v48 = vmul.f32 -1.442695, %v269_v35 }
 0x131   :  { %v336_v38 = vpop.f32.mrb[4].mxu0 }
 0x132   :  { %v341_v39 = vrot.slane %v336_v38, 2  ;;  %v2313_v40 = vpop.f32.mrb[5].mxu0 }
 0x134   :  { %v343_v42 = vadd.f32 %v341_v39, %v3013_v37 }
 0x136   :  { %v350_v43 = vadd.f32 %v3018_v41, %v343_v42 }
 0x138   :  { %v2591_v44 = vpop.eup %2590  ;;  %2592 = vtanh.f32 %v350_v43  ;;  %v2183_v49 = vmul.f32 -1.442695, %v350_v43 }
 0x139   :  { %360 = vrot.lane.b32.xlu0 %v2591_v44, %s2850_s8  ;;  %2594 = vpow2.f32 %v2182_v48 }
 0x13a   :  { %2596 = vpow2.f32 %v2183_v49 }
 0x142   :  { %v2593_v46 = vpop.eup %2592 }
 0x143   :  { %384 = vrot.lane.b32.xlu0 %v2593_v46, %s2850_s8  ;;  %v2595_v50 = vpop.eup %2594 }
 0x144   :  { %v354_v51 = vadd.f32 1.0, %v2595_v50  ;;  %v2597_v52 = vpop.eup %2596 }
 0x145   :  { %v378_v54 = vadd.f32 1.0, %v2597_v52 }
 0x146   :  { %2598 = vrcp.f32 %v354_v51 }
 0x147   :  { %401 = vperm.xlu0 %2588, %v399_v47   ;;  %2600 = vrcp.f32 %v378_v54 }
 0x14b   :  { %408 = vperm.xlu0 %2588, %v406_v53  }
 0x150   :  { %v2599_v55 = vpop.eup %2598 }
 0x151   :  { %v2601_v58 = vpop.eup %2600  ;;  %v358_v61 = vmul.f32 0.0, %v2599_v55 }
 0x152   :  { %v382_v2 = vmul.f32 0.0, %v2601_v58 }
 0x1ab   :  { %v361_v56 = vpop.permute.xlu0 %360 }
 0x1ac   :  { %v363_v57 = vmul.f32 %v2599_v55, %v361_v56 }
 0x1ae   :  { %365 = vrot.lane.b32.xlu1 %v363_v57, %s2851_s1 }
 0x1b5   :  { %v385_v59 = vpop.permute.xlu0 %384 }
 0x1b6   :  { %v387_v60 = vmul.f32 %v2601_v58, %v385_v59 }
 0x1b8   :  { %389 = vrot.lane.b32.xlu1 %v387_v60, %s2851_s1 }
 0x1c6   :  { %v3040_v7 = vpop.permute.xlu0 %401 }
 0x1c7   :  { %vm403_vm4 = vcmp.eq.s32.totalorder %v3040_v7, 1 }
 0x1ca   :  { %v3059_v17 = vpop.permute.xlu0 %408 }
 0x1cb   :  { %vm410_vm6 = vcmp.eq.s32.totalorder %v3059_v17, 1 }
 0x220   :  { %v366_v62 = vpop.permute.xlu1 %365 }
 0x221   :  { %v3035_v63 = vadd.f32 %v366_v62, %v358_v61 }
 0x223   :  { %2602 = vtanh.f32 %v3035_v63 }
 0x22a   :  { %v390_v3 = vpop.permute.xlu1 %389 }
 0x22b   :  { %v392_v4 = vadd.f32 %v390_v3, %v382_v2 }
 0x22d   :  { %v2603_v5 = vpop.eup %2602  ;;  %2604 = vtanh.f32 %v392_v4  ;;  %v418_v15 = vrot.slane %v392_v4, 6 }
 0x22e   :  { %371 = vrot.lane.b32.xlu1 %v2603_v5, %s2850_s8 }
 0x237   :  { %v2605_v6 = vpop.eup %2604 }
 0x238   :  { %395 = vrot.lane.b32.xlu1 %v2605_v6, %s2850_s8 }
 0x2a0   :  { %v372_v8 = vpop.permute.xlu1 %371 }
 0x2a1   :  { %v374_v9 = vmul.f32 %v2599_v55, %v372_v8  ;;  %v647_v8 = vsel %vm435_vm7, 1, %v2849_v28 }
 0x2a3   :  { %v404_v11 = vsel %vm403_vm4, %v374_v9, 0.0  ;;  %v667_v9 = vsel %vm436_vm8, 1, %v2849_v28 }
 0x2a4   :  { %424 = vrot.lane.b32.xlu1 %v404_v11, %s2851_s1 }
 0x2aa   :  { %v396_v12 = vpop.permute.xlu1 %395 }
 0x2ab   :  { %v398_v13 = vmul.f32 %v2601_v58, %v396_v12  ;;  %v405_v58 = vsel %vm403_vm4, %v3035_v63, 0.0 }
 0x2ac   :  { %v599_v59 = vrot.slane %v405_v58, 6 }
 0x2ad   :  { %v412_v14 = vrot.slane %v398_v13, 6 }
 0x2af   :  { %413 = vrot.lane.b32.xlu0 %v412_v14, %s2851_s1 }
 0x2b3   :  { %419 = vrot.lane.b32.xlu0 %v418_v15, %s2852_s11 }
 0x316   :  { %v3048_v16 = vpop.permute.xlu1 %424 }
 0x317   :  { %428 = vst.msk [vmem:[#allocation10] sm:$0x3] %vm427_vm5, %v3048_v16  ;;  %2323 = vmatmul.mubr.msk.f32.vlgmr.msra.gmra.mrb[2].mxu1 %vm103_vm1, %v3048_v16 }
 0x318   :  { %2502 = vmatpush3.bf16.msra.mxu1 %v2962_v10  ;;  %2344 = vmatprep.mubr.msk.f32.mxu1 %vm2848_vm0, %v2847_v1 }
 0x319   :  { %2503 = vmatprep.subr.bf16.mxu1 %v2846_v0 }
 0x31c   :  { %2505 = vmatpush3.bf16.msra.mxu1 %v2965_v19 }
 0x31d   :  { %2512 = vmatprep.subr.bf16.mxu1 %v2846_v0 }
 0x321   :  { %v414_v18 = vpop.permute.xlu0 %413 }
 0x322   :  { %v3065_v20 = vsel %vm410_vm6, %v414_v18, 0.0 }
 0x323   :  { %2334 = vmatmul.mubr.msk.f32.vlgmr.msra.gmra.mrb[6].mxu0 %vm103_vm1, %v3065_v20 }
 0x324   :  { %2508 = vmatpush3.bf16.msra.mxu0 %v2969_v23  ;;  %2355 = vmatprep.mubr.msk.f32.mxu0 %vm2848_vm0, %v2847_v1 }
 0x325   :  { %2509 = vmatprep.subr.bf16.mxu0 %v2846_v0  ;;  %v420_v40 = vpop.permute.xlu0 %419 }
 0x326   :  { %v3082_v43 = vsel %vm410_vm6, %v420_v40, 0.0 }
 0x327   :  { %v626_v44 = vrot.slane %v3082_v43, 4 }
 0x328   :  { %2511 = vmatpush3.bf16.msra.mxu0 %v2977_v27 }
 0x329   :  { %2518 = vmatprep.subr.bf16.mxu0 %v2846_v0 }
 0x3ea   :  { %v505_v21 = vpop.f32.mrb[2].mxu1 }
 0x3eb   :  { %v510_v22 = vrot.slane %v505_v21, 6  ;;  %v2324_v24 = vpop.f32.mrb[3].mxu1 }
 0x3ed   :  { %v512_v25 = vadd.f32 %v510_v22, %v3000_v29 }
 0x3ef   :  { %v513_v26 = vadd.f32 %v3005_v30, %v512_v25 }
 0x3f1   :  { %2606 = vtanh.f32 %v513_v26  ;;  %v2186_v46 = vmul.f32 -1.442695, %v513_v26 }
 0x3f6   :  { %v582_v31 = vpop.f32.mrb[6].mxu0 }
 0x3f7   :  { %v587_v32 = vrot.slane %v582_v31, 4  ;;  %v2335_v34 = vpop.f32.mrb[7].mxu0 }
 0x3f9   :  { %v589_v35 = vadd.f32 %v587_v32, %v3013_v37 }
 0x3fb   :  { %v2607_v38 = vpop.eup %2606  ;;  %v590_v39 = vadd.f32 %v3018_v41, %v589_v35 }
 0x3fc   :  { %603 = vrot.lane.b32.xlu1 %v2607_v38, %s2850_s8 }
 0x3fd   :  { %2608 = vtanh.f32 %v590_v39  ;;  %v2187_v47 = vmul.f32 -1.442695, %v590_v39 }
 0x3fe   :  { %2610 = vpow2.f32 %v2186_v46 }
 0x3ff   :  { %2612 = vpow2.f32 %v2187_v47 }
 0x407   :  { %v2609_v42 = vpop.eup %2608 }
 0x408   :  { %632 = vrot.lane.b32.xlu1 %v2609_v42, %s2850_s8  ;;  %v2611_v48 = vpop.eup %2610 }
 0x409   :  { %v594_v49 = vadd.f32 1.0, %v2611_v48  ;;  %v2613_v50 = vpop.eup %2612 }
 0x40a   :  { %v621_v51 = vadd.f32 1.0, %v2613_v50 }
 0x40b   :  { %2614 = vrcp.f32 %v594_v49 }
 0x40c   :  { %627 = vrot.lane.b32.xlu1 %v626_v44, %s2851_s1  ;;  %2616 = vrcp.f32 %v621_v51 }
 0x415   :  { %v2615_v52 = vpop.eup %2614 }
 0x416   :  { %v2617_v55 = vpop.eup %2616  ;;  %v601_v60 = vmul.f32 %v2615_v52, %v599_v59 }
 0x46e   :  { %v604_v53 = vpop.permute.xlu1 %603 }
 0x46f   :  { %v606_v54 = vmul.f32 %v2615_v52, %v604_v53 }
 0x471   :  { %608 = vrot.lane.b32.xlu0 %v606_v54, %s2851_s1 }
 0x47a   :  { %v633_v56 = vpop.permute.xlu1 %632 }
 0x47b   :  { %v635_v57 = vmul.f32 %v2617_v55, %v633_v56 }
 0x47d   :  { %637 = vrot.lane.b32.xlu0 %v635_v57, %s2851_s1 }
 0x47e   :  { %v628_v2 = vpop.permute.xlu1 %627 }
 0x47f   :  { %v630_v3 = vmul.f32 %v2617_v55, %v628_v2 }
 0x4e3   :  { %v609_v61 = vpop.permute.xlu0 %608 }
 0x4e4   :  { %v611_v62 = vadd.f32 %v609_v61, %v601_v60 }
 0x4e6   :  { %2618 = vtanh.f32 %v611_v62  ;;  %v659_v14 = vrot.slane %v611_v62, 2 }
 0x4ef   :  { %v638_v4 = vpop.permute.xlu0 %637 }
 0x4f0   :  { %v2619_v5 = vpop.eup %2618  ;;  %v640_v6 = vadd.f32 %v638_v4, %v630_v3 }
 0x4f1   :  { %614 = vrot.lane.b32.xlu1 %v2619_v5, %s2850_s8 }
 0x4f2   :  { %2620 = vtanh.f32 %v640_v6  ;;  %v679_v22 = vrot.slane %v640_v6, 4 }
 0x4f5   :  { %649 = vperm.xlu1 %2589, %v647_v8  }
 0x4fc   :  { %v2621_v63 = vpop.eup %2620 }
 0x4fd   :  { %643 = vrot.lane.b32.xlu0 %v2621_v63, %s2850_s8 }
 0x501   :  { %669 = vperm.xlu0 %2588, %v667_v9  }
 0x563   :  { %v615_v11 = vpop.permute.xlu1 %614 }
 0x564   :  { %v617_v12 = vmul.f32 %v2615_v52, %v615_v11 }
 0x566   :  { %v653_v13 = vrot.slane %v617_v12, 2 }
 0x568   :  { %654 = vrot.lane.b32.xlu1 %v653_v13, %s2851_s1 }
 0x56c   :  { %660 = vrot.lane.b32.xlu1 %v659_v14, %s2852_s11 }
 0x56f   :  { %v644_v15 = vpop.permute.xlu0 %643 }
 0x570   :  { %v646_v18 = vmul.f32 %v2617_v55, %v644_v15 }
 0x572   :  { %v673_v21 = vrot.slane %v646_v18, 4 }
 0x574   :  { %674 = vrot.lane.b32.xlu0 %v673_v21, %s2851_s1  ;;  %v3103_v24 = vpop.permute.xlu1 %649 }
 0x575   :  { %vm651_vm9 = vcmp.eq.s32.totalorder %v3103_v24, 1 }
 0x578   :  { %663 = vrot.lane.b32.xlu0 %v405_v58, %s2852_s11 }
 0x57c   :  { %680 = vrot.lane.b32.xlu0 %v679_v22, %s2852_s11 }
 0x580   :  { %v3121_v32 = vpop.permute.xlu0 %669 }
 0x581   :  { %vm671_vm10 = vcmp.eq.s32.totalorder %v3121_v32, 1 }
 0x5da   :  { %v655_v25 = vpop.permute.xlu1 %654 }
 0x5db   :  { %v3109_v26 = vsel %vm651_vm9, %v655_v25, %v3048_v16  ;;  %v684_v31 = vsel %vm651_vm9, %v655_v25, 0.0  ;;  %v908_v25 = vsel %vm692_vm11, 1, %v2849_v28 }
 0x5dc   :  { %685 = vst.msk [vmem:[#allocation10 + $0x2] sm:$0x3] %vm427_vm5, %v684_v31  ;;  %2345 = vmatmul.mubr.msk.f32.vlgmr.msra.gmra.mrb[4].mxu1 %vm103_vm1, %v3109_v26 }
 0x5dd   :  { %2514 = vmatpush3.bf16.msra.mxu1 %v2962_v10  ;;  %2366 = vmatprep.mubr.msk.f32.mxu1 %vm2848_vm0, %v2847_v1 }
 0x5de   :  { %2515 = vmatprep.subr.bf16.mxu1 %v2846_v0  ;;  %v661_v35 = vpop.permute.xlu1 %660 }
 0x5e1   :  { %2517 = vmatpush3.bf16.msra.mxu1 %v2965_v19 }
 0x5e2   :  { %2524 = vmatprep.subr.bf16.mxu1 %v2846_v0 }
 0x5e6   :  { %v3125_v16 = vpop.permute.xlu0 %674 }
 0x5e7   :  { %v3131_v34 = vsel %vm671_vm10, %v3125_v16, %v3065_v20 }
 0x5e8   :  { %2356 = vmatmul.mubr.msk.f32.vlgmr.msra.gmra.mrb[8].mxu0 %vm103_vm1, %v3131_v34 }
 0x5e9   :  { %2520 = vmatpush3.bf16.msra.mxu0 %v2969_v23  ;;  %2377 = vmatprep.mubr.msk.f32.mxu0 %vm2848_vm0, %v2847_v1 }
 0x5ea   :  { %v664_v38 = vpop.permute.xlu0 %663  ;;  %2521 = vmatprep.subr.bf16.mxu0 %v2846_v0 }
 0x5eb   :  { %v3141_v39 = vsel %vm651_vm9, %v661_v35, %v664_v38  ;;  %v925_v35 = vsel %vm693_vm12, 1, %v2849_v28 }
 0x5ec   :  { %v858_v40 = vrot.slane %v3141_v39, 4 }
 0x5ed   :  { %2523 = vmatpush3.bf16.msra.mxu0 %v2977_v27 }
 0x5ee   :  { %859 = vrot.lane.b32.xlu0 %v858_v40, %s2851_s1  ;;  %v681_v42 = vpop.permute.xlu0 %680  ;;  %2530 = vmatprep.subr.bf16.mxu0 %v2846_v0 }
 0x5ef   :  { %v3150_v44 = vsel %vm671_vm10, %v681_v42, %v3082_v43 }
 0x5f0   :  { %v887_v46 = vrot.slane %v3150_v44, 6 }
 0x5f2   :  { %888 = vrot.lane.b32.xlu0 %v887_v46, %s2851_s1 }
 0x660   :  { %v860_v9 = vpop.permute.xlu0 %859 }
 0x664   :  { %v889_v14 = vpop.permute.xlu0 %888 }
 0x6af   :  { %v763_v47 = vpop.f32.mrb[4].mxu1 }
 0x6b0   :  { %v768_v48 = vrot.slane %v763_v47, 4  ;;  %v2346_v49 = vpop.f32.mrb[5].mxu1 }
 0x6b2   :  { %v770_v50 = vadd.f32 %v768_v48, %v3000_v29 }
 0x6b4   :  { %v771_v51 = vadd.f32 %v3005_v30, %v770_v50 }
 0x6b6   :  { %2622 = vtanh.f32 %v771_v51  ;;  %v2190_v58 = vmul.f32 -1.442695, %v771_v51 }
 0x6bb   :  { %v841_v52 = vpop.f32.mrb[8].mxu0 }
 0x6bc   :  { %v846_v53 = vrot.slane %v841_v52, 6  ;;  %v2357_v54 = vpop.f32.mrb[9].mxu0 }
 0x6be   :  { %v848_v55 = vadd.f32 %v846_v53, %v3013_v37 }
 0x6c0   :  { %v2623_v56 = vpop.eup %2622  ;;  %v849_v43 = vadd.f32 %v3018_v41, %v848_v55 }
 0x6c1   :  { %864 = vrot.lane.b32.xlu1 %v2623_v56, %s2850_s8 }
 0x6c2   :  { %2624 = vtanh.f32 %v849_v43  ;;  %v2191_v59 = vmul.f32 -1.442695, %v849_v43 }
 0x6c3   :  { %2626 = vpow2.f32 %v2190_v58 }
 0x6c4   :  { %2628 = vpow2.f32 %v2191_v59 }
 0x6cc   :  { %v2625_v57 = vpop.eup %2624 }
 0x6cd   :  { %893 = vrot.lane.b32.xlu1 %v2625_v57, %s2850_s8  ;;  %v2627_v60 = vpop.eup %2626 }
 0x6ce   :  { %v853_v61 = vadd.f32 1.0, %v2627_v60  ;;  %v2629_v62 = vpop.eup %2628  ;;  %v1179_v60 = vsel %vm951_vm15, 1, %v2849_v28 }
 0x6cf   :  { %v882_v2 = vadd.f32 1.0, %v2629_v62 }
 0x6d0   :  { %2630 = vrcp.f32 %v853_v61 }
 0x6d1   :  { %2632 = vrcp.f32 %v882_v2 }
 0x6da   :  { %v2631_v3 = vpop.eup %2630 }
 0x6db   :  { %v2633_v6 = vpop.eup %2632  ;;  %v862_v11 = vmul.f32 %v2631_v3, %v860_v9 }
 0x6dc   :  { %v891_v15 = vmul.f32 %v2633_v6, %v889_v14 }
 0x733   :  { %v865_v4 = vpop.permute.xlu1 %864 }
 0x734   :  { %v867_v5 = vmul.f32 %v2631_v3, %v865_v4 }
 0x736   :  { %869 = vrot.lane.b32.xlu1 %v867_v5, %s2851_s1 }
 0x73f   :  { %v894_v8 = vpop.permute.xlu1 %893 }
 0x740   :  { %v896_v63 = vmul.f32 %v2633_v6, %v894_v8 }
 0x742   :  { %898 = vrot.lane.b32.xlu1 %v896_v63, %s2851_s1 }
 0x7a8   :  { %v870_v12 = vpop.permute.xlu1 %869 }
 0x7a9   :  { %v872_v13 = vadd.f32 %v870_v12, %v862_v11 }
 0x7ab   :  { %2634 = vtanh.f32 %v872_v13  ;;  %v920_v46 = vrot.slane %v872_v13, 4 }
 0x7b4   :  { %v899_v18 = vpop.permute.xlu1 %898 }
 0x7b5   :  { %v2635_v21 = vpop.eup %2634  ;;  %v901_v22 = vadd.f32 %v899_v18, %v891_v15 }
 0x7b6   :  { %875 = vrot.lane.b32.xlu0 %v2635_v21, %s2850_s8 }
 0x7b7   :  { %2636 = vtanh.f32 %v901_v22  ;;  %v937_v47 = vrot.slane %v901_v22, 2 }
 0x7ba   :  { %910 = vperm.xlu0 %2588, %v908_v25  }
 0x7c1   :  { %v2637_v31 = vpop.eup %2636 }
 0x7c2   :  { %904 = vrot.lane.b32.xlu1 %v2637_v31, %s2850_s8 }
 0x7c6   :  { %927 = vperm.xlu1 %2589, %v925_v35  }
 0x828   :  { %v876_v38 = vpop.permute.xlu0 %875 }
 0x829   :  { %v878_v40 = vmul.f32 %v2631_v3, %v876_v38 }
 0x82b   :  { %v914_v42 = vrot.slane %v878_v40, 4 }
 0x82d   :  { %915 = vrot.lane.b32.xlu0 %v914_v42, %s2851_s1 }
 0x831   :  { %921 = vrot.lane.b32.xlu0 %v920_v46, %s2852_s11 }
 0x834   :  { %v905_v48 = vpop.permute.xlu1 %904 }
 0x835   :  { %v907_v49 = vmul.f32 %v2633_v6, %v905_v48  ;;  %938 = vrot.lane.b32.xlu0 %v937_v47, %s2852_s11 }
 0x837   :  { %v931_v50 = vrot.slane %v907_v49, 2 }
 0x839   :  { %932 = vrot.lane.b32.xlu1 %v931_v50, %s2851_s1  ;;  %v3172_v51 = vpop.permute.xlu0 %910 }
 0x83a   :  { %vm912_vm13 = vcmp.eq.s32.totalorder %v3172_v51, 1 }
 0x845   :  { %v3195_v43 = vpop.permute.xlu1 %927 }
 0x846   :  { %vm929_vm14 = vcmp.eq.s32.totalorder %v3195_v43, 1 }
 0x89f   :  { %v916_v52 = vpop.permute.xlu0 %915 }
 0x8a0   :  { %v3178_v53 = vsel %vm912_vm13, %v916_v52, %v3109_v26  ;;  %v942_v54 = vsel %vm912_vm13, %v916_v52, 0.0  ;;  %v1162_v52 = vsel %vm950_vm2, 1, %v2849_v28 }
 0x8a1   :  { %943 = vst.msk [vmem:[#allocation10 + $0x4] sm:$0x3] %vm427_vm5, %v942_v54  ;;  %2367 = vmatmul.mubr.msk.f32.vlgmr.msra.gmra.mrb[6].mxu1 %vm103_vm1, %v3178_v53 }
 0x8a2   :  { %2526 = vmatpush3.bf16.msra.mxu1 %v2962_v10  ;;  %2388 = vmatprep.mubr.msk.f32.mxu1 %vm2848_vm0, %v2847_v1 }
 0x8a3   :  { %v922_v55 = vpop.permute.xlu0 %921  ;;  %2527 = vmatprep.subr.bf16.mxu1 %v2846_v0 }
 0x8a4   :  { %v3192_v26 = vsel %vm912_vm13, %v922_v55, %v3141_v39 }
 0x8a5   :  { %v1113_v56 = vrot.slane %v3192_v26, 2 }
 0x8a6   :  { %2529 = vmatpush3.bf16.msra.mxu1 %v2965_v19 }
 0x8a7   :  { %1114 = vrot.lane.b32.xlu0 %v1113_v56, %s2851_s1  ;;  %v939_v57 = vpop.permute.xlu0 %938  ;;  %2536 = vmatprep.subr.bf16.mxu1 %v2846_v0 }
 0x8a8   :  { %v941_v39 = vsel %vm929_vm14, %v939_v57, %v3150_v44 }
 0x8ab   :  { %v3205_v58 = vpop.permute.xlu1 %932  ;;  %1142 = vrot.lane.b32.xlu0 %v941_v39, %s2851_s1 }
 0x8ac   :  { %v935_v59 = vsel %vm929_vm14, %v3205_v58, %v3131_v34 }
 0x8ad   :  { %2378 = vmatmul.mubr.msk.f32.vlgmr.msra.gmra.mrb[10].mxu0 %vm103_vm1, %v935_v59 }
 0x8ae   :  { %2532 = vmatpush3.bf16.msra.mxu0 %v2969_v23  ;;  %2399 = vmatprep.mubr.msk.f32.mxu0 %vm2848_vm0, %v2847_v1 }
 0x8af   :  { %1181 = vperm.xlu0 %2588, %v1179_v60   ;;  %2533 = vmatprep.subr.bf16.mxu0 %v2846_v0 }
 0x8b2   :  { %2535 = vmatpush3.bf16.msra.mxu0 %v2977_v27 }
 0x8b3   :  { %2542 = vmatprep.subr.bf16.mxu0 %v2846_v0 }
 0x919   :  { %v1115_v31 = vpop.permute.xlu0 %1114 }
 0x91d   :  { %v3228_v42 = vpop.permute.xlu0 %1142 }
 0x92e   :  { %v3240_v57 = vpop.permute.xlu0 %1181 }
 0x92f   :  { %vm1183_vm3 = vcmp.eq.s32.totalorder %v3240_v57, 1 }
 0x974   :  { %v1021_v44 = vpop.f32.mrb[6].mxu1 }
 0x975   :  { %v1026_v61 = vrot.slane %v1021_v44, 2  ;;  %v2368_v62 = vpop.f32.mrb[7].mxu1 }
 0x977   :  { %v1028_v34 = vadd.f32 %v1026_v61, %v3000_v29 }
 0x979   :  { %v1029_v2 = vadd.f32 %v3005_v30, %v1028_v34 }
 0x97b   :  { %2638 = vtanh.f32 %v1029_v2  ;;  %v2194_v9 = vmul.f32 -1.442695, %v1029_v2 }
 0x980   :  { %v1099_v3 = vpop.f32.mrb[10].mxu0 }
 0x981   :  { %v1103_v4 = vadd.f32 %v1099_v3, %v3013_v37  ;;  %v2379_v5 = vpop.f32.mrb[11].mxu0 }
 0x983   :  { %v1104_v6 = vadd.f32 %v3018_v41, %v1103_v4 }
 0x985   :  { %v2639_v8 = vpop.eup %2638  ;;  %2640 = vtanh.f32 %v1104_v6  ;;  %v2195_v11 = vmul.f32 -1.442695, %v1104_v6 }
 0x986   :  { %1119 = vrot.lane.b32.xlu1 %v2639_v8, %s2850_s8  ;;  %2642 = vpow2.f32 %v2194_v9 }
 0x987   :  { %2644 = vpow2.f32 %v2195_v11 }
 0x98f   :  { %v2641_v63 = vpop.eup %2640 }
 0x990   :  { %1147 = vrot.lane.b32.xlu1 %v2641_v63, %s2850_s8  ;;  %v2643_v29 = vpop.eup %2642 }
 0x991   :  { %v1108_v12 = vadd.f32 1.0, %v2643_v29  ;;  %v2645_v13 = vpop.eup %2644 }
 0x992   :  { %v1137_v14 = vadd.f32 1.0, %v2645_v13 }
 0x993   :  { %2646 = vrcp.f32 %v1108_v12 }
 0x994   :  { %2648 = vrcp.f32 %v1137_v14 }
 0x99d   :  { %v2647_v37 = vpop.eup %2646 }
 0x99e   :  { %v2649_v21 = vpop.eup %2648  ;;  %v1117_v35 = vmul.f32 %v2647_v37, %v1115_v31 }
 0x99f   :  { %v1145_v46 = vmul.f32 %v2649_v21, %v3228_v42 }
 0x9f8   :  { %v1120_v15 = vpop.permute.xlu1 %1119 }
 0x9f9   :  { %v1122_v18 = vmul.f32 %v2647_v37, %v1120_v15 }
 0x9fb   :  { %1124 = vrot.lane.b32.xlu1 %v1122_v18, %s2851_s1 }
 0xa02   :  { %v1148_v22 = vpop.permute.xlu1 %1147 }
 0xa03   :  { %v1150_v25 = vmul.f32 %v2649_v21, %v1148_v22 }
 0xa05   :  { %1152 = vrot.lane.b32.xlu1 %v1150_v25, %s2851_s1 }
 0xa6d   :  { %v1125_v38 = vpop.permute.xlu1 %1124 }
 0xa6e   :  { %v1127_v40 = vadd.f32 %v1125_v38, %v1117_v35 }
 0xa70   :  { %2650 = vtanh.f32 %v1127_v40  ;;  %v1174_v39 = vrot.slane %v1127_v40, 6 }
 0xa77   :  { %v1153_v47 = vpop.permute.xlu1 %1152 }
 0xa78   :  { %v3231_v48 = vadd.f32 %v1153_v47, %v1145_v46 }
 0xa7a   :  { %v2651_v49 = vpop.eup %2650  ;;  %2652 = vtanh.f32 %v3231_v48 }
 0xa7b   :  { %1130 = vrot.lane.b32.xlu1 %v2651_v49, %s2850_s8 }
 0xa7f   :  { %1184 = vrot.lane.b32.xlu1 %v935_v59, %s2852_s11 }
 0xa84   :  { %v2653_v50 = vpop.eup %2652 }
 0xa85   :  { %1158 = vrot.lane.b32.xlu0 %v2653_v50, %s2850_s8 }
 0xa89   :  { %1164 = vperm.xlu0 %2588, %v1162_v52  }
 0xaed   :  { %v1131_v54 = vpop.permute.xlu1 %1130 }
 0xaee   :  { %v1133_v55 = vmul.f32 %v2647_v37, %v1131_v54  ;;  %v1188_v54 = vsel %vm1183_vm3, %v3231_v48, %v3228_v42 }
 0xaf0   :  { %v1168_v56 = vrot.slane %v1133_v55, 6  ;;  %v1388_v55 = vrot.slane %v1188_v54, 2 }
 0xaf1   :  { %v1185_v45 = vpop.permute.xlu1 %1184 }
 0xaf2   :  { %1169 = vrot.lane.b32.xlu1 %v1168_v56, %s2851_s1 }
 0xaf6   :  { %1175 = vrot.lane.b32.xlu1 %v1174_v39, %s2852_s11 }
 0xaf7   :  { %v1159_v60 = vpop.permute.xlu0 %1158 }
 0xaf8   :  { %v3243_v59 = vmul.f32 %v2649_v21, %v1159_v60 }
 0xafa   :  { %v1187_v28 = vsel %vm1183_vm3, %v3243_v59, %v1185_v45 }
 0xafb   :  { %1273 = vrot.lane.b32.xlu0 %v1187_v28, %s2851_s1 }
 0xb08   :  { %v3250_v44 = vpop.permute.xlu0 %1164 }
 0xb09   :  { %vm1166_vm7 = vcmp.eq.s32.totalorder %v3250_v44, 1 }
 0xb64   :  { %v1170_v61 = vpop.permute.xlu1 %1169 }
 0xb65   :  { %v3256_v62 = vsel %vm1166_vm7, %v1170_v61, %v3178_v53  ;;  %v1189_v34 = vsel %vm1166_vm7, %v1170_v61, 0.0 }
 0xb66   :  { %1190 = vst.msk [vmem:[#allocation10 + $0x6] sm:$0x3] %vm427_vm5, %v1189_v34  ;;  %2389 = vmatmul.mubr.msk.f32.vlgmr.msra.gmra.mrb[8].mxu1 %vm103_vm1, %v3256_v62 }
 0xb67   :  { %2538 = vmatpush3.bf16.msra.mxu1 %v2962_v10  ;;  %2410 = vmatprep.mubr.msk.f32.mxu1 %vm2848_vm0, %v2847_v1 }
 0xb68   :  { %2539 = vmatprep.subr.bf16.mxu1 %v2846_v0  ;;  %v1176_v12 = vpop.permute.xlu1 %1175 }
 0xb69   :  { %v1178_v13 = vsel %vm1166_vm7, %v1176_v12, %v3192_v26 }
 0xb6b   :  { %2541 = vmatpush3.bf16.msra.mxu1 %v2965_v19 }
 0xb6c   :  { %2548 = vmatprep.subr.bf16.mxu1 %v2846_v0 }
 0xb6d   :  { %v3269_v53 = vpop.permute.xlu0 %1273 }
 0xb6e   :  { %2400 = vmatmul.mubr.msk.f32.vlgmr.msra.gmra.mrb[12].mxu0 %vm103_vm1, %v3269_v53 }
 0xb6f   :  { %2544 = vmatpush3.bf16.msra.mxu0 %v2969_v23  ;;  %2421 = vmatprep.mubr.msk.f32.mxu0 %vm2848_vm0, %v2847_v1 }
 0xb70   :  { %2545 = vmatprep.subr.bf16.mxu0 %v2846_v0 }
 0xb73   :  { %2547 = vmatpush3.bf16.msra.mxu0 %v2977_v27 }
 0xb74   :  { %2554 = vmatprep.subr.bf16.mxu0 %v2846_v0 }
 0xc39   :  { %v1266_v2 = vpop.f32.mrb[8].mxu1 }
 0xc3a   :  { %v1270_v3 = vadd.f32 %v1266_v2, %v3011_v36  ;;  %v2390_v4 = vpop.f32.mrb[9].mxu1 }
 0xc3c   :  { %v1271_v5 = vadd.f32 %v3005_v30, %v1270_v3 }
 0xc3e   :  { %2654 = vtanh.f32 %v1271_v5  ;;  %v2198_v37 = vmul.f32 -1.442695, %v1271_v5 }
 0xc41   :  { %v1343_v6 = vpop.f32.mrb[12].mxu0 }
 0xc42   :  { %v1348_v8 = vrot.slane %v1343_v6, 2  ;;  %v2401_v63 = vpop.f32.mrb[13].mxu0 }
 0xc44   :  { %v1350_v9 = vadd.f32 %v1348_v8, %v3008_v33 }
 0xc46   :  { %v1351_v11 = vadd.f32 %v3018_v41, %v1350_v9 }
 0xc48   :  { %v2655_v29 = vpop.eup %2654  ;;  %2656 = vtanh.f32 %v1351_v11  ;;  %v2199_v15 = vmul.f32 -1.442695, %v1351_v11 }
 0xc49   :  { %1365 = vrot.lane.b32.xlu0 %v2655_v29, %s2850_s8  ;;  %2658 = vpow2.f32 %v2198_v37 }
 0xc4a   :  { %2660 = vpow2.f32 %v2199_v15 }
 0xc4d   :  { %1360 = vrot.lane.b32.xlu0 %v1178_v13, %s2851_s1 }
 0xc52   :  { %v2657_v14 = vpop.eup %2656 }
 0xc53   :  { %1392 = vrot.lane.b32.xlu1 %v2657_v14, %s2850_s8  ;;  %v2659_v18 = vpop.eup %2658 }
 0xc54   :  { %v1355_v21 = vadd.f32 1.0, %v2659_v18  ;;  %v2661_v22 = vpop.eup %2660 }
 0xc55   :  { %v1383_v25 = vadd.f32 1.0, %v2661_v22 }
 0xc56   :  { %2662 = vrcp.f32 %v1355_v21 }
 0xc57   :  { %2664 = vrcp.f32 %v1383_v25 }
 0xc60   :  { %v2663_v31 = vpop.eup %2662 }
 0xc61   :  { %v2665_v26 = vpop.eup %2664 }
 0xc62   :  { %v1390_v56 = vmul.f32 %v2665_v26, %v1388_v55 }
 0xcbb   :  { %v1366_v35 = vpop.permute.xlu0 %1365 }
 0xcbc   :  { %v1368_v38 = vmul.f32 %v2663_v31, %v1366_v35 }
 0xcbe   :  { %1370 = vrot.lane.b32.xlu1 %v1368_v38, %s2851_s1 }
 0xcbf   :  { %v3291_v47 = vpop.permute.xlu0 %1360 }
 0xcc0   :  { %v1363_v49 = vmul.f32 %v2663_v31, %v3291_v47 }
 0xcc5   :  { %v1393_v40 = vpop.permute.xlu1 %1392 }
 0xcc6   :  { %v1395_v46 = vmul.f32 %v2665_v26, %v1393_v40 }
 0xcc8   :  { %1397 = vrot.lane.b32.xlu0 %v1395_v46, %s2851_s1 }
 0xd30   :  { %v1371_v50 = vpop.permute.xlu1 %1370 }
 0xd31   :  { %v3294_v52 = vadd.f32 %v1371_v50, %v1363_v49 }
 0xd33   :  { %2666 = vtanh.f32 %v3294_v52 }
 0xd3a   :  { %v1398_v39 = vpop.permute.xlu0 %1397 }
 0xd3b   :  { %v1400_v60 = vadd.f32 %v1398_v39, %v1390_v56 }
 0xd3d   :  { %v2667_v45 = vpop.eup %2666  ;;  %2668 = vtanh.f32 %v1400_v60  ;;  %v1420_v5 = vrot.slane %v1400_v60, 6  ;;  %v1411_v60 = vsel %vm1183_vm3, %v3294_v52, %v3291_v47 }
 0xd3e   :  { %1376 = vrot.lane.b32.xlu1 %v2667_v45, %s2850_s8  ;;  %v1606_v45 = vrot.slane %v1411_v60, 6 }
 0xd42   :  { %1407 = vrot.lane.b32.xlu1 %v3256_v62, %s2852_s11 }
 0xd47   :  { %v2669_v28 = vpop.eup %2668 }
 0xd48   :  { %1403 = vrot.lane.b32.xlu0 %v2669_v28, %s2850_s8 }
 0xdb0   :  { %v1377_v61 = vpop.permute.xlu1 %1376 }
 0xdb1   :  { %v3305_v34 = vmul.f32 %v2663_v31, %v1377_v61 }
 0xdb4   :  { %v1408_v2 = vpop.permute.xlu1 %1407 }
 0xdb5   :  { %v1410_v42 = vsel %vm1183_vm3, %v3305_v34, %v1408_v2 }
 0xdb6   :  { %1441 = vrot.lane.b32.xlu0 %v1410_v42, %s2851_s1 }
 0xdba   :  { %v1404_v48 = vpop.permute.xlu0 %1403 }
 0xdbb   :  { %v1406_v3 = vmul.f32 %v2665_v26, %v1404_v48 }
 0xdbd   :  { %v1413_v4 = vrot.slane %v1406_v3, 6 }
 0xdbf   :  { %1414 = vrot.lane.b32.xlu1 %v1413_v4, %s2851_s1 }
 0xdc3   :  { %1421 = vrot.lane.b32.xlu1 %v1420_v5, %s2852_s11 }
 0xe28   :  { %v3313_v62 = vpop.permute.xlu0 %1441 }
 0xe29   :  { %2411 = vmatmul.mubr.msk.f32.vlgmr.msra.gmra.mrb[10].mxu1 %vm103_vm1, %v3313_v62 }
 0xe2a   :  { %2550 = vmatpush3.bf16.msra.mxu1 %v2962_v10  ;;  %2432 = vmatprep.mubr.msk.f32.mxu1 %vm2848_vm0, %v2847_v1 }
 0xe2b   :  { %2551 = vmatprep.subr.bf16.mxu1 %v2846_v0 }
 0xe2e   :  { %2553 = vmatpush3.bf16.msra.mxu1 %v2965_v19 }
 0xe2f   :  { %2560 = vmatprep.subr.bf16.mxu1 %v2846_v0 }
 0xe31   :  { %v3323_v6 = vpop.permute.xlu1 %1414 }
 0xe32   :  { %v3329_v8 = vsel %vm1166_vm7, %v3323_v6, %v3269_v53 }
 0xe33   :  { %2422 = vmatmul.mubr.msk.f32.vlgmr.msra.gmra.mrb[14].mxu0 %vm103_vm1, %v3329_v8 }
 0xe34   :  { %2556 = vmatpush3.bf16.msra.mxu0 %v2969_v23  ;;  %2443 = vmatprep.mubr.msk.f32.mxu0 %vm2848_vm0, %v2847_v1 }
 0xe35   :  { %2557 = vmatprep.subr.bf16.mxu0 %v2846_v0  ;;  %v1422_v46 = vpop.permute.xlu1 %1421 }
 0xe38   :  { %2559 = vmatpush3.bf16.msra.mxu0 %v2977_v27 }
 0xe39   :  { %2566 = vmatprep.subr.bf16.mxu0 %v2846_v0 }
 0xefc   :  { %v1511_v63 = vpop.f32.mrb[10].mxu1 }
 0xefd   :  { %v1516_v9 = vrot.slane %v1511_v63, 6  ;;  %v2412_v11 = vpop.f32.mrb[11].mxu1 }
 0xeff   :  { %v1518_v53 = vadd.f32 %v1516_v9, %v3011_v36 }
 0xf01   :  { %v1519_v29 = vadd.f32 %v3005_v30, %v1518_v53 }
 0xf03   :  { %2670 = vtanh.f32 %v1519_v29  ;;  %v2202_v22 = vmul.f32 -1.442695, %v1519_v29 }
 0xf06   :  { %v1589_v12 = vpop.f32.mrb[14].mxu0 }
 0xf07   :  { %v1594_v13 = vrot.slane %v1589_v12, 4  ;;  %v2423_v14 = vpop.f32.mrb[15].mxu0 }
 0xf09   :  { %v1596_v37 = vadd.f32 %v1594_v13, %v3008_v33 }
 0xf0b   :  { %v1597_v15 = vadd.f32 %v3018_v41, %v1596_v37 }
 0xf0d   :  { %v2671_v18 = vpop.eup %2670  ;;  %2672 = vtanh.f32 %v1597_v15  ;;  %v2203_v30 = vmul.f32 -1.442695, %v1597_v15 }
 0xf0e   :  { %1610 = vrot.lane.b32.xlu0 %v2671_v18, %s2850_s8  ;;  %2674 = vpow2.f32 %v2202_v22 }
 0xf0f   :  { %2676 = vpow2.f32 %v2203_v30 }
 0xf12   :  { %1424 = vrot.lane.b32.xlu0 %v1188_v54, %s2852_s11 }
 0xf17   :  { %v2673_v21 = vpop.eup %2672 }
 0xf18   :  { %1639 = vrot.lane.b32.xlu1 %v2673_v21, %s2850_s8  ;;  %v2675_v25 = vpop.eup %2674 }
 0xf19   :  { %v1601_v31 = vadd.f32 1.0, %v2675_v25  ;;  %v2677_v35 = vpop.eup %2676 }
 0xf1a   :  { %v1628_v38 = vadd.f32 1.0, %v2677_v35 }
 0xf1b   :  { %2678 = vrcp.f32 %v1601_v31 }
 0xf1c   :  { %2680 = vrcp.f32 %v1628_v38 }
 0xf25   :  { %v2679_v26 = vpop.eup %2678 }
 0xf26   :  { %v2681_v55 = vpop.eup %2680  ;;  %v1608_v28 = vmul.f32 %v2679_v26, %v1606_v45 }
 0xf80   :  { %v1611_v41 = vpop.permute.xlu0 %1610 }
 0xf81   :  { %v1613_v40 = vmul.f32 %v2679_v26, %v1611_v41 }
 0xf83   :  { %1615 = vrot.lane.b32.xlu0 %v1613_v40, %s2851_s1  ;;  %v3415_v40 = vld [vmem:[%s3535_s6] ss:$0 sm:$0xff] }
 0xf84   :  { %v1425_v49 = vpop.permute.xlu0 %1424 }
 0xf85   :  { %v1427_v50 = vsel %vm1166_vm7, %v1422_v46, %v1425_v49 }
 0xf86   :  { %v1633_v54 = vrot.slane %v1427_v50, 4 }
 0xf88   :  { %1634 = vrot.lane.b32.xlu1 %v1633_v54, %s2851_s1 }
 0xf8a   :  { %v1640_v56 = vpop.permute.xlu1 %1639 }
 0xf8b   :  { %v1642_v39 = vmul.f32 %v2681_v55, %v1640_v56 }
 0xf8d   :  { %1644 = vrot.lane.b32.xlu0 %v1642_v39, %s2851_s1 }
 0xff5   :  { %v1616_v61 = vpop.permute.xlu0 %1615 }
 0xff6   :  { %v1618_v2 = vadd.f32 %v1616_v61, %v1608_v28 }
 0xff8   :  { %2682 = vtanh.f32 %v1618_v2  ;;  %v1662_v47 = vrot.slane %v1618_v2, 2 }
 0xffa   :  { %v1635_v42 = vpop.permute.xlu1 %1634 }
 0xffb   :  { %v1637_v48 = vmul.f32 %v2681_v55, %v1635_v42 }
 0xfff   :  { %v1645_v3 = vpop.permute.xlu0 %1644 }
0x1000   :  { %v1647_v4 = vadd.f32 %v1645_v3, %v1637_v48 }
0x1002   :  { %v2683_v5 = vpop.eup %2682  ;;  %2684 = vtanh.f32 %v1647_v4  ;;  %v1677_v13 = vrot.slane %v1647_v4, 4 }
0x1003   :  { %1621 = vrot.lane.b32.xlu1 %v2683_v5, %s2850_s8 }
0x100c   :  { %v2685_v63 = vpop.eup %2684 }
0x100d   :  { %1650 = vrot.lane.b32.xlu0 %v2685_v63, %s2850_s8 }
0x1075   :  { %v1622_v9 = vpop.permute.xlu1 %1621 }
0x1076   :  { %v1624_v11 = vmul.f32 %v2679_v26, %v1622_v9 }
0x1078   :  { %v1655_v53 = vrot.slane %v1624_v11, 2 }
0x107a   :  { %1656 = vrot.lane.b32.xlu1 %v1655_v53, %s2851_s1 }
0x107e   :  { %1663 = vrot.lane.b32.xlu1 %v1662_v47, %s2852_s11 }
0x107f   :  { %v1651_v52 = vpop.permute.xlu0 %1650 }
0x1080   :  { %v1653_v29 = vmul.f32 %v2681_v55, %v1651_v52 }
0x1082   :  { %v1671_v12 = vrot.slane %v1653_v29, 4 }
0x1084   :  { %1672 = vrot.lane.b32.xlu0 %v1671_v12, %s2851_s1 }
0x1088   :  { %1666 = vrot.lane.b32.xlu0 %v1411_v60, %s2852_s11 }
0x108c   :  { %1678 = vrot.lane.b32.xlu0 %v1677_v13, %s2852_s11 }
0x10ec   :  { %v3362_v14 = vpop.permute.xlu1 %1656 }
0x10ed   :  { %v3368_v37 = vsel %vm929_vm14, %v3362_v14, %v3313_v62  ;;  %v1682_v51 = vsel %vm929_vm14, %v3362_v14, 0.0 }
0x10ee   :  { %2433 = vmatmul.mubr.msk.f32.vlgmr.msra.gmra.mrb[12].mxu1 %vm103_vm1, %v3368_v37 }
0x10ef   :  { %2562 = vmatpush3.bf16.msra.mxu1 %v2962_v10  ;;  %2454 = vmatprep.mubr.msk.f32.mxu1 %vm2848_vm0, %v2847_v1 }
0x10f0   :  { %2563 = vmatprep.subr.bf16.mxu1 %v2846_v0  ;;  %v1664_v10 = vpop.permute.xlu1 %1663 }
0x10f3   :  { %2565 = vmatpush3.bf16.msra.mxu1 %v2965_v19 }
0x10f6   :  { %v3377_v15 = vpop.permute.xlu0 %1672 }
0x10f7   :  { %v3383_v62 = vsel %vm912_vm13, %v3377_v15, %v3329_v8 }
0x10f8   :  { %2444 = vmatmul.mubr.msk.f32.vlgmr.msra.gmra.mrb[16].mxu0 %vm103_vm1, %v3383_v62 }
0x10f9   :  { %2568 = vmatpush3.bf16.msra.mxu0 %v2969_v23  ;;  %2465 = vmatprep.mubr.msk.f32.mxu0 %vm2848_vm0, %v2847_v1  ;;  %vm433_vm0 = vcmask 517376  }
0x10fa   :  { %v1667_v18 = vpop.permute.xlu0 %1666  ;;  %2569 = vmatprep.subr.bf16.mxu0 %v2846_v0 }
0x10fb   :  { %v3393_v19 = vsel %vm929_vm14, %v1664_v10, %v1667_v18 }
0x10fc   :  { %v1854_v21 = vrot.slane %v3393_v19, 4 }
0x10fd   :  { %2571 = vmatpush3.bf16.msra.mxu0 %v2977_v27  ;;  %v3408_v27 = vld [vmem:[%s3534_s5] ss:$0 sm:$0xff]  ;;  %s2853_s5 = smov [#allocation10]  }
0x10fe   :  { %v1679_v8 = vpop.permute.xlu0 %1678  ;;  %1855 = vrot.lane.b32.xlu0 %v1854_v21, %s2851_s1  ;;  %s2164_s6 = sshll.u32 %s2853_s5, 4  ;;  %s2165_s6 = int_to_ptr.vmem [resolvable:$true] %s2164_s6 }
0x10ff   :  { %v3400_v23 = vsel %vm912_vm13, %v1679_v8, %v1427_v50  ;;  %s2808_s0 = scalar_lea.vmem %s2165_s6, 256  ;;  %p2813_p5 = scmp.lt.s32.totalorder %s2165_s6, %s2165_s6 }
0x1100   :  { %v1883_v1 = vrot.slane %v3400_v23, 6  ;;  %p2809_p4 = scmp.ne.s32.totalorder %s2165_s6, %s2808_s0  ;;  %p2814_p6 = scmp.lt.s32.totalorder %s2808_s0, %s2808_s0 }
0x1102   :  { %1884 = vrot.lane.b32.xlu0 %v1883_v1, %s2851_s1  ;;  %p2815_p7 = por %p2814_p6, %p2813_p5 }
0x1104   :  { %p2816_p8 = pnand %p2815_p7, %p2809_p4 }
0x1170   :  { %v1856_v4 = vpop.permute.xlu0 %1855 }
0x1174   :  { %v1885_v11 = vpop.permute.xlu0 %1884 }
0x11c1   :  { %v1759_v0 = vpop.f32.mrb[12].mxu1 }
0x11c2   :  { %v1764_v22 = vrot.slane %v1759_v0, 4  ;;  %v2434_v30 = vpop.f32.mrb[13].mxu1 }
0x11c4   :  { %v1766_v25 = vadd.f32 %v1764_v22, %v3011_v36 }
0x11c6   :  { %v1767_v31 = vadd.f32 %v3408_v27, %v1766_v25 }
0x11c8   :  { %2686 = vtanh.f32 %v1767_v31  ;;  %v2206_v54 = vmul.f32 -1.442695, %v1767_v31 }
0x11cb   :  { %v1837_v35 = vpop.f32.mrb[16].mxu0 }
0x11cc   :  { %v1842_v38 = vrot.slane %v1837_v35, 6  ;;  %v2445_v26 = vpop.f32.mrb[17].mxu0 }
0x11ce   :  { %v1844_v41 = vadd.f32 %v1842_v38, %v3008_v33 }
0x11d0   :  { %v1845_v46 = vadd.f32 %v3415_v40, %v1844_v41 }
0x11d2   :  { %v2687_v49 = vpop.eup %2686  ;;  %2688 = vtanh.f32 %v1845_v46  ;;  %v2207_v55 = vmul.f32 -1.442695, %v1845_v46 }
0x11d3   :  { %1860 = vrot.lane.b32.xlu1 %v2687_v49, %s2850_s8  ;;  %2690 = vpow2.f32 %v2206_v54 }
0x11d4   :  { %2692 = vpow2.f32 %v2207_v55 }
0x11dc   :  { %v2689_v50 = vpop.eup %2688 }
0x11dd   :  { %1889 = vrot.lane.b32.xlu1 %v2689_v50, %s2850_s8  ;;  %v2691_v56 = vpop.eup %2690 }
0x11de   :  { %v1849_v39 = vadd.f32 1.0, %v2691_v56  ;;  %v2693_v60 = vpop.eup %2692 }
0x11df   :  { %v1878_v45 = vadd.f32 1.0, %v2693_v60 }
0x11e0   :  { %2694 = vrcp.f32 %v1849_v39 }
0x11e1   :  { %2696 = vrcp.f32 %v1878_v45 }
0x11ea   :  { %v2695_v28 = vpop.eup %2694 }
0x11eb   :  { %v2697_v42 = vpop.eup %2696  ;;  %v1858_v5 = vmul.f32 %v2695_v28, %v1856_v4 }
0x11ec   :  { %v1887_v53 = vmul.f32 %v2697_v42, %v1885_v11 }
0x1245   :  { %v1861_v61 = vpop.permute.xlu1 %1860 }
0x1246   :  { %v1863_v2 = vmul.f32 %v2695_v28, %v1861_v61 }
0x1248   :  { %1865 = vrot.lane.b32.xlu1 %v1863_v2, %s2851_s1 }
0x124f   :  { %v1890_v48 = vpop.permute.xlu1 %1889 }
0x1250   :  { %v1892_v3 = vmul.f32 %v2697_v42, %v1890_v48 }
0x1252   :  { %1894 = vrot.lane.b32.xlu1 %v1892_v3, %s2851_s1 }
0x12ba   :  { %v1866_v63 = vpop.permute.xlu1 %1865 }
0x12bb   :  { %v1868_v9 = vadd.f32 %v1866_v63, %v1858_v5 }
0x12bd   :  { %2698 = vtanh.f32 %v1868_v9  ;;  %v1911_v21 = vrot.slane %v1868_v9, 4 }
0x12c4   :  { %v1895_v47 = vpop.permute.xlu1 %1894 }
0x12c5   :  { %v1897_v52 = vadd.f32 %v1895_v47, %v1887_v53 }
0x12c7   :  { %v2699_v29 = vpop.eup %2698  ;;  %2700 = vtanh.f32 %v1897_v52  ;;  %v1923_v1 = vrot.slane %v1897_v52, 2 }
0x12c8   :  { %1871 = vrot.lane.b32.xlu0 %v2699_v29, %s2850_s8 }
0x12d1   :  { %v2701_v12 = vpop.eup %2700 }
0x12d2   :  { %1900 = vrot.lane.b32.xlu1 %v2701_v12, %s2850_s8 }
0x133a   :  { %v1872_v13 = vpop.permute.xlu0 %1871 }
0x133b   :  { %v1874_v10 = vmul.f32 %v2695_v28, %v1872_v13 }
0x133d   :  { %v1905_v18 = vrot.slane %v1874_v10, 4 }
0x133f   :  { %1906 = vrot.lane.b32.xlu0 %v1905_v18, %s2851_s1  ;;  %v944_v18 = vsel %vm929_vm14, %v3205_v58, 0.0  ;;  %v1428_v58 = vsel %vm1183_vm3, %v3305_v34, 0.0 }
0x1343   :  { %1912 = vrot.lane.b32.xlu0 %v1911_v21, %s2852_s11  ;;  %v686_v21 = vsel %vm671_vm10, %v3125_v16, 0.0  ;;  %v1684_v16 = vsel %vm912_vm13, %v3377_v15, 0.0 }
0x1344   :  { %v1901_v8 = vpop.permute.xlu1 %1900 }
0x1345   :  { %v1903_v0 = vmul.f32 %v2697_v42, %v1901_v8  ;;  %v1434_v8 = vsel %vm1166_vm7, %v3323_v6, 0.0 }
0x1347   :  { %v1917_v22 = vrot.slane %v1903_v0, 2  ;;  %1924 = vrot.lane.b32.xlu0 %v1923_v1, %s2852_s11 }
0x1349   :  { %1918 = vrot.lane.b32.xlu1 %v1917_v22, %s2851_s1 }
0x13b1   :  { %v3428_v30 = vpop.permute.xlu0 %1906 }
0x13b2   :  { %v1909_v25 = vsel %vm671_vm10, %v3428_v30, %v3368_v37 }
0x13b3   :  { %2455 = vmatmul.mubr.msk.f32.vlgmr.msra.gmra.mrb[14].mxu1 %vm103_vm1, %v1909_v25 }
0x13b5   :  { %v1913_v31 = vpop.permute.xlu0 %1912 }
0x13b6   :  { %v1915_v35 = vsel %vm671_vm10, %v1913_v31, %v3393_v19  ;;  %v1928_v31 = vsel %vm671_vm10, %v3428_v30, 0.0 }
0x13b7   :  { %v2097_v38 = vrot.slane %v1915_v35, 2 }
0x13b9   :  { %2098 = vrot.lane.b32.xlu0 %v2097_v38, %s2851_s1  ;;  %v1925_v26 = vpop.permute.xlu0 %1924 }
0x13ba   :  { %v1927_v37 = vsel %vm651_vm9, %v1925_v26, %v3400_v23 }
0x13bb   :  { %v3439_v41 = vpop.permute.xlu1 %1918 }
0x13bc   :  { %v1921_v46 = vsel %vm651_vm9, %v3439_v41, %v3383_v62  ;;  %v1930_v57 = vsel %vm651_vm9, %v3439_v41, 0.0 }
0x13bd   :  { %2466 = vmatmul.mubr.msk.f32.vlgmr.msra.gmra.mrb[18].mxu0 %vm103_vm1, %v1921_v46  ;;  %2126 = vrot.lane.b32.xlu0 %v1927_v37, %s2851_s1 }
0x142b   :  { %v2099_v63 = vpop.permute.xlu0 %2098 }
0x142f   :  { %v2127_v47 = vpop.permute.xlu0 %2126 }
0x1486   :  { %v2005_v19 = vpop.f32.mrb[14].mxu1 }
0x1487   :  { %v2010_v49 = vrot.slane %v2005_v19, 2  ;;  %v2456_v50 = vpop.f32.mrb[15].mxu1 }
0x1489   :  { %v2012_v54 = vadd.f32 %v2010_v49, %v3011_v36 }
0x148b   :  { %v2013_v55 = vadd.f32 %v3408_v27, %v2012_v54 }
0x148d   :  { %2702 = vtanh.f32 %v2013_v55  ;;  %v2210_v28 = vmul.f32 -1.442695, %v2013_v55 }
0x1490   :  { %v2083_v56 = vpop.f32.mrb[18].mxu0 }
0x1491   :  { %v2087_v39 = vadd.f32 %v2083_v56, %v3008_v33  ;;  %v2467_v62 = vpop.f32.mrb[19].mxu0 }
0x1493   :  { %v2088_v60 = vadd.f32 %v3415_v40, %v2087_v39 }
0x1495   :  { %2704 = vtanh.f32 %v2088_v60  ;;  %v2211_v61 = vmul.f32 -1.442695, %v2088_v60 }
0x1496   :  { %2706 = vpow2.f32 %v2210_v28 }
0x1497   :  { %v2703_v23 = vpop.eup %2702  ;;  %2708 = vpow2.f32 %v2211_v61 }
0x1498   :  { %2103 = vrot.lane.b32.xlu1 %v2703_v23, %s2850_s8 }
0x149f   :  { %v2705_v45 = vpop.eup %2704 }
0x14a0   :  { %2131 = vrot.lane.b32.xlu1 %v2705_v45, %s2850_s8  ;;  %v2707_v36 = vpop.eup %2706 }
0x14a1   :  { %v2092_v27 = vadd.f32 1.0, %v2707_v36  ;;  %v2709_v2 = vpop.eup %2708 }
0x14a2   :  { %v2121_v42 = vadd.f32 1.0, %v2709_v2 }
0x14a3   :  { %2710 = vrcp.f32 %v2092_v27 }
0x14a4   :  { %2712 = vrcp.f32 %v2121_v42 }
0x14ad   :  { %v2711_v33 = vpop.eup %2710 }
0x14ae   :  { %v2713_v3 = vpop.eup %2712  ;;  %v2101_v9 = vmul.f32 %v2711_v33, %v2099_v63 }
0x14af   :  { %v2129_v52 = vmul.f32 %v2713_v3, %v2127_v47 }
0x150a   :  { %v2104_v48 = vpop.permute.xlu1 %2103 }
0x150b   :  { %v2106_v40 = vmul.f32 %v2711_v33, %v2104_v48 }
0x150d   :  { %2108 = vrot.lane.b32.xlu1 %v2106_v40, %s2851_s1 }
0x1512   :  { %v2132_v4 = vpop.permute.xlu1 %2131 }
0x1513   :  { %v2134_v5 = vmul.f32 %v2713_v3, %v2132_v4 }
0x1515   :  { %2136 = vrot.lane.b32.xlu1 %v2134_v5, %s2851_s1 }
0x157f   :  { %v2109_v11 = vpop.permute.xlu1 %2108 }
0x1580   :  { %v2111_v53 = vadd.f32 %v2109_v11, %v2101_v9 }
0x1582   :  { %2714 = vtanh.f32 %v2111_v53 }
0x1587   :  { %v2137_v29 = vpop.permute.xlu1 %2136 }
0x1588   :  { %v2139_v12 = vadd.f32 %v2137_v29, %v2129_v52 }
0x158a   :  { %2716 = vtanh.f32 %v2139_v12 }
0x158c   :  { %v2715_v13 = vpop.eup %2714 }
0x158d   :  { %2114 = vrot.lane.b32.xlu0 %v2715_v13, %s2850_s8 }
0x1591   :  { %430 = vrot.lane.b32.xlu0 %v3065_v20, %s2851_s1  ;;  %v1191_v20 = vsel %vm1183_vm3, %v3243_v59, 0.0 }
0x1594   :  { %v2717_v10 = vpop.eup %2716 }
0x1595   :  { %2142 = vrot.lane.b32.xlu1 %v2717_v10, %s2850_s8  ;;  %946 = vrot.lane.b32.xlu0 %v944_v18, %s2851_s1 }
0x1599   :  { %688 = vrot.lane.b32.xlu1 %v686_v21, %s2851_s1  ;;  %1436 = vrot.lane.b32.xlu0 %v1434_v8, %s2851_s1 }
0x159d   :  { %1193 = vrot.lane.b32.xlu1 %v1191_v20, %s2850_s8 }
0x15a1   :  { %1430 = vrot.lane.b32.xlu1 %v1428_v58, %s2851_s1 }
0x15a5   :  { %1686 = vrot.lane.b32.xlu1 %v1684_v16, %s2851_s1 }
0x15ff   :  { %v2115_v44 = vpop.permute.xlu0 %2114 }
0x1600   :  { %v2117_v6 = vmul.f32 %v2711_v33, %v2115_v44 }
0x1602   :  { %v2147_v1 = vrot.slane %v2117_v6, 6 }
0x1603   :  { %v431_v0 = vpop.permute.xlu0 %430 }
0x1604   :  { %434 = vst.msk [vmem:[#allocation10 + $0xe] sm:$0x3] %vm433_vm0, %v431_v0  ;;  %2148 = vrot.lane.b32.xlu0 %v2147_v1, %s2851_s1 }
0x1607   :  { %v2143_v59 = vpop.permute.xlu1 %2142  ;;  %v947_v34 = vpop.permute.xlu0 %946 }
0x1608   :  { %v2145_v15 = vmul.f32 %v2713_v3, %v2143_v59  ;;  %949 = vst.msk [vmem:[#allocation10 + $0xa] sm:$0x3] %vm433_vm0, %v947_v34  ;;  %1932 = vrot.lane.b32.xlu0 %v1930_v57, %s2851_s1 }
0x1609   :  { %1683 = vst.msk [vmem:[#allocation10 + $0xa] sm:$0x3] %vm427_vm5, %v1682_v51 }
0x160a   :  { %v2153_v22 = vsel %vm403_vm4, %v2145_v15, 0.0 }
0x160b   :  { %2155 = vrot.lane.b32.xlu1 %v2153_v22, %s2850_s8  ;;  %v689_v24 = vpop.permute.xlu1 %688  ;;  %v1437_v25 = vpop.permute.xlu0 %1436 }
0x160c   :  { %691 = vst.msk [vmem:[#allocation10 + $0xc] sm:$0x3] %vm433_vm0, %v689_v24  ;;  %1439 = vst.msk [vmem:[#allocation10 + $0x6] sm:$0x3] %vm433_vm0, %v1437_v25 }
0x160d   :  { %1929 = vst.msk [vmem:[#allocation10 + $0xc] sm:$0x3] %vm427_vm5, %v1928_v31 }
0x160f   :  { %v1194_v43 = vpop.permute.xlu1 %1193 }
0x1610   :  { %1196 = vst.msk [vmem:[#allocation10 + $0x8] sm:$0x3] %vm433_vm0, %v1194_v43 }
0x1613   :  { %v1431_v14 = vpop.permute.xlu1 %1430 }
0x1614   :  { %1433 = vst.msk [vmem:[#allocation10 + $0x8] sm:$0x3] %vm427_vm5, %v1431_v14 }
0x1617   :  { %v1687_v7 = vpop.permute.xlu1 %1686 }
0x1618   :  { %1689 = vst.msk [vmem:[#allocation10 + $0x4] sm:$0x3] %vm433_vm0, %v1687_v7 }
0x1676   :  { %v2149_v35 = vpop.permute.xlu0 %2148 }
0x1677   :  { %v2151_v32 = vsel %vm410_vm6, %v2149_v35, 0.0 }
0x1678   :  { %2152 = vst.msk [vmem:[#allocation10 + $0xe] sm:$0x3] %vm427_vm5, %v2151_v32 }
0x167a   :  { %v1933_v30 = vpop.permute.xlu0 %1932 }
0x167b   :  { %1935 = vst.msk [vmem:[#allocation10 + $0x2] sm:$0x3] %vm433_vm0, %v1933_v30 }
0x167d   :  { %v2156_v38 = vpop.permute.xlu1 %2155 }
0x167e   :  { %2158 = vst.msk [vmem:[#allocation10] sm:$0x3] %vm433_vm0, %v2156_v38 }
0x167f   :  { %2819 = shalt.err (!%p2816_p8)
}
0x1680   :  { %s2820_s18 = scalar_lea.hbm %s3536_s7, 256 }
0x1681   :  { %p2821_p9 = scmp.ne.s32.totalorder %s3536_s7, %s2820_s18  ;;  %p2824_p10 = scmp.lt.u32.totalorder %s2820_s18, %s3536_s7 }
0x1683   :  { %p2826_p11 = pnand %p2824_p10, %p2821_p9 }
0x1685   :  { %2829 = shalt.err (!%p2826_p11)
}
0x1686   :  { %2170 = dma.vmem_to_hbm [thread:$0]  %s2165_s6, 256, %s3536_s7, [#allocation4], %s2842_s2, %s2842_s2, %s2843_s25  }
0x1687   :  { %2836 = dma.done.wait [#allocation4], 256  }
0x1688   :  { %2837 = vsyncadd [#allocation4], 4294967040 }
0x1689   :  { %2174 = vsyncpa [#allocation3], 1 }
0x168a   :  { %2175 = vsyncpa [#allocation6], 1 }
0x168b   :  { %2176 = vsyncpa [#allocation9], 1 }
0x168c   :  { %2177 = vsyncpa [#allocation4], 1 }

</bundles_post_ra>
